<compile_context>
chip_gen: v7x
topology: tpu7x:2x2x1
jax: 0.10.0
libtpu: 0.0.40
codegen_flags: <defaults>
</compile_context>

<pallas_src>
import jax
import jax.numpy as jnp
from jax.experimental import pallas as pl
from jax.experimental.pallas import tpu as pltpu

INPUT_DIM = 2
HIDDEN_DIM = 50
OUTPUT_DIM = 3
NUM_BLOCKS = 6
OUT_ROWS = 8  # widened / zero-padded output head (rows 0..3 are used)


def _mish(x):
    # mish(x) = x * tanh(softplus(x)) = x * e*(e+2) / (e*(e+2) + 2), e = exp(x).
    # One exp + one approximate reciprocal per element (both EUP ops); saturate
    # to x for large inputs so the clamped exp never overflows f32.
    e = jnp.exp(jnp.minimum(x, 20.0))
    t = e * (e + 2.0)
    inv = pl.reciprocal(t + 2.0, approx=True)
    return jnp.where(x > 20.0, x, x * t * inv)


def _diffusion_kernel(x_ref, win_ref, bin_ref,
                      w1s_ref, b1s_ref, w2s_ref, b2s_ref,
                      wout_ref, bout_ref, o_ref):
    x = x_ref[...]        # (INPUT_DIM, TILE_B) f32, batch in lanes
    win = win_ref[...]    # (H, 2) f32

    # Input layer as two VPU broadcast MACs (a K=2 matmul would waste an MXU
    # push/pop and serialize the pipeline start), then Mish.
    h = _mish(win[:, 0:1] * x[0:1, :] + win[:, 1:2] * x[1:2, :] + bin_ref[...])

    # Residual blocks on the MXU with bf16 operands, f32 accumulation:
    #   h = h + W2 @ mish(W1 @ h + b1) + b2
    for i in range(NUM_BLOCKS):
        t = _mish(jnp.dot(w1s_ref[i], h.astype(jnp.bfloat16),
                          preferred_element_type=jnp.float32) + b1s_ref[i])
        h = h + jnp.dot(w2s_ref[i], t.astype(jnp.bfloat16),
                        preferred_element_type=jnp.float32) + b2s_ref[i]

    # Widened output head: rows are [o0, o2, o2, o1, 0, 0, 0, 0]
    # = [BBT00, BBT01, BBT10, BBT11, pad...].
    out = jnp.dot(wout_ref[...], h.astype(jnp.bfloat16),
                  preferred_element_type=jnp.float32) + bout_ref[...]

    # exp() on the diagonal rows (0 and 3) with one full-width select.
    rid = jax.lax.broadcasted_iota(jnp.int32, out.shape, 0)
    diag = (rid == 0) | (rid == 3)
    o_ref[...] = jnp.where(diag, jnp.exp(out), out)


def diffusion_net_pallas(x, params, tile_b=4096):
    (win, bin_, w1s, b1s, w2s, b2s, wout, bout) = params
    batch = x.shape[0]

    # Lane-friendly tiling (multiples of 128). Guarantee >= 2 grid steps
    # whenever the padded batch allows it so v7x's 2 TensorCores both get work
    # under dimension_semantics=("parallel",); cap the tile at tile_b.
    padded_min = max(128, ((batch + 127) // 128) * 128)
    if padded_min >= 256:
        tb = min(tile_b, max(128, (padded_min // 2) // 128 * 128))
    else:
        tb = 128
    padded = ((batch + tb - 1) // tb) * tb
    grid = (padded // tb,)

    # One-time glue in the wrapper (cheap XLA ops).
    x_t = jnp.pad(x.T.astype(jnp.float32), ((0, 0), (0, padded - batch)))
    bin2 = bin_[:, None]                       # (H, 1)  f32
    b1s2 = b1s[:, :, None]                     # (NB, H, 1) f32
    b2s2 = b2s[:, :, None]                     # (NB, H, 1) f32

    # bf16 MXU operands; biases and accumulation stay f32.
    w1s_b = w1s.astype(jnp.bfloat16)
    w2s_b = w2s.astype(jnp.bfloat16)

    # Output head widened to [o0, o2, o2, o1] and zero-padded to 8 rows so the
    # output tile stores as full (8, 128) vregs.
    wout4 = jnp.stack([wout[0], wout[2], wout[2], wout[1]])            # (4, H)
    bout4 = jnp.stack([bout[0], bout[2], bout[2], bout[1]])            # (4,)
    wout8 = jnp.concatenate(
        [wout4, jnp.zeros((OUT_ROWS - 4, HIDDEN_DIM), wout4.dtype)]
    ).astype(jnp.bfloat16)                                             # (8, H) bf16
    bout8 = jnp.concatenate(
        [bout4, jnp.zeros((OUT_ROWS - 4,), bout4.dtype)])[:, None]     # (8, 1) f32

    weight_bytes = int(sum(a.size * a.dtype.itemsize for a in
                           (win, bin2, w1s_b, b1s2, w2s_b, b2s2, wout8, bout8)))
    cost = pl.CostEstimate(
        flops=int(2 * padded * HIDDEN_DIM * (INPUT_DIM + 2 * NUM_BLOCKS * HIDDEN_DIM)
                  + 2 * padded * OUT_ROWS * HIDDEN_DIM),
        transcendentals=int(padded * (2 * HIDDEN_DIM * (1 + NUM_BLOCKS) + OUT_ROWS)),
        bytes_accessed=int(padded * (INPUT_DIM + OUT_ROWS) * 4 + weight_bytes),
    )

    out_t = pl.pallas_call(
        _diffusion_kernel,
        out_shape=jax.ShapeDtypeStruct((OUT_ROWS, padded), jnp.float32),
        grid=grid,
        in_specs=[
            pl.BlockSpec((INPUT_DIM, tb), lambda i: (0, i)),
            pl.BlockSpec((HIDDEN_DIM, INPUT_DIM), lambda i: (0, 0)),
            pl.BlockSpec((HIDDEN_DIM, 1), lambda i: (0, 0)),
            pl.BlockSpec((NUM_BLOCKS, HIDDEN_DIM, HIDDEN_DIM), lambda i: (0, 0, 0)),
            pl.BlockSpec((NUM_BLOCKS, HIDDEN_DIM, 1), lambda i: (0, 0, 0)),
            pl.BlockSpec((NUM_BLOCKS, HIDDEN_DIM, HIDDEN_DIM), lambda i: (0, 0, 0)),
            pl.BlockSpec((NUM_BLOCKS, HIDDEN_DIM, 1), lambda i: (0, 0, 0)),
            pl.BlockSpec((OUT_ROWS, HIDDEN_DIM), lambda i: (0, 0)),
            pl.BlockSpec((OUT_ROWS, 1), lambda i: (0, 0)),
        ],
        out_specs=pl.BlockSpec((OUT_ROWS, tb), lambda i: (0, i)),
        compiler_params=pltpu.CompilerParams(
            dimension_semantics=("parallel",),
            vmem_limit_bytes=32 * 1024 * 1024),
        cost_estimate=cost,
    )(x_t, win, bin2, w1s_b, b1s2, w2s_b, b2s2, wout8, bout8)

    # Glue: (8, padded) -> rows [00, 01, 10, 11] -> (batch, 2, 2).
    return out_t[:4, :batch].T.reshape(batch, 2, 2)


def init_params(key):
    """Deterministic synthetic parameters, torch-native (out, in) weight layout.

    w2s / wout are mildly scaled so activations stay O(1) through the 6
    residual blocks — keeps the bf16-MXU kernel vs. f32 reference comparison
    well-conditioned (exp() at the head would otherwise amplify tiny rounding
    differences into large relative errors).
    """
    ks = jax.random.split(key, 4 + 2 * NUM_BLOCKS)
    it = iter(ks)

    win = jax.random.normal(next(it), (HIDDEN_DIM, INPUT_DIM), jnp.float32) * 0.5
    bin_ = jax.random.normal(next(it), (HIDDEN_DIM,), jnp.float32) * 0.1

    std = (2.0 / HIDDEN_DIM) ** 0.5  # kaiming_normal(fan_out) with relu gain
    w1s, w2s = [], []
    for _ in range(NUM_BLOCKS):
        w1s.append(jax.random.normal(next(it), (HIDDEN_DIM, HIDDEN_DIM), jnp.float32) * std)
        w2s.append(jax.random.normal(next(it), (HIDDEN_DIM, HIDDEN_DIM), jnp.float32) * std * 0.3)
    w1s = jnp.stack(w1s)
    w2s = jnp.stack(w2s)
    b1s = jnp.zeros((NUM_BLOCKS, HIDDEN_DIM), jnp.float32)
    b2s = jnp.zeros((NUM_BLOCKS, HIDDEN_DIM), jnp.float32)

    wout = jax.random.normal(next(it), (OUTPUT_DIM, HIDDEN_DIM), jnp.float32) * 0.05
    bout = jax.random.normal(next(it), (OUTPUT_DIM,), jnp.float32) * 0.05

    return (win, bin_, w1s, b1s, w2s, b2s, wout, bout)


def diffusion_net_ref(x, params):
    """Pure-JAX f32 reference (exact torch formulation: x * tanh(softplus(x)))."""
    (win, bin_, w1s, b1s, w2s, b2s, wout, bout) = params

    def mish(v):
        return v * jnp.tanh(jnp.logaddexp(v, 0.0))

    h = mish(x @ win.T + bin_)
    for i in range(NUM_BLOCKS):
        t = mish(h @ w1s[i].T + b1s[i])
        h = h + t @ w2s[i].T + b2s[i]
    out = h @ wout.T + bout

    batch = x.shape[0]
    bbt = jnp.zeros((batch, 2, 2), jnp.float32)
    bbt = bbt.at[:, 0, 0].set(jnp.exp(out[:, 0]))
    bbt = bbt.at[:, 1, 1].set(jnp.exp(out[:, 1]))
    bbt = bbt.at[:, 0, 1].set(out[:, 2])
    bbt = bbt.at[:, 1, 0].set(out[:, 2])
    return bbt


if __name__ == "__main__":
    key = jax.random.PRNGKey(0)
    pkey, xkey = jax.random.split(key)

    params = init_params(pkey)
    batch = 8
    x = jax.random.normal(xkey, (batch, INPUT_DIM), jnp.float32)

    bbt = jax.block_until_ready(diffusion_net_pallas(x, params))
    ref = diffusion_net_ref(x, params)

    assert bbt.shape == (batch, 2, 2)
    # Tolerance reflects bf16 MXU operands (f32 accumulation) through a
    # 13-matmul-deep residual stack vs. the pure-f32 reference.
    assert jnp.allclose(bbt, ref, rtol=5e-2, atol=5e-2), (
        f"max abs err {jnp.max(jnp.abs(bbt - ref))}")

    print("KERNEL_OK")
</pallas_src>

<mosaic_0001>
module attributes {stable_mosaic.version = 11 : i64} {
  func.func @_diffusion_kernel(%arg0: i32, %arg1: memref<2x128xf32, #tpu.memory_space<vmem>>, %arg2: memref<50x2xf32, #tpu.memory_space<vmem>>, %arg3: memref<50x1xf32, #tpu.memory_space<vmem>>, %arg4: memref<6x50x50xbf16, #tpu.memory_space<vmem>>, %arg5: memref<6x50x1xf32, #tpu.memory_space<vmem>>, %arg6: memref<6x50x50xbf16, #tpu.memory_space<vmem>>, %arg7: memref<6x50x1xf32, #tpu.memory_space<vmem>>, %arg8: memref<8x50xbf16, #tpu.memory_space<vmem>>, %arg9: memref<8x1xf32, #tpu.memory_space<vmem>>, %arg10: memref<8x128xf32, #tpu.memory_space<vmem>>) attributes {dimension_semantics = [#tpu.dimension_semantics<parallel>], iteration_bounds = array<i64: 1>, scalar_prefetch = 0 : i64, scratch_operands = 0 : i64, tpu.core_type = #tpu.core_type<tc>, window_params = [{transform_indices = @transform_0, window_bounds = array<i64: 2, 128>}, {pipeline_mode = #tpu.pipeline_mode<synchronous>, transform_indices = @transform_1, window_bounds = array<i64: 50, 2>}, {pipeline_mode = #tpu.pipeline_mode<synchronous>, transform_indices = @transform_2, window_bounds = array<i64: 50, 1>}, {pipeline_mode = #tpu.pipeline_mode<synchronous>, transform_indices = @transform_3, window_bounds = array<i64: 6, 50, 50>}, {pipeline_mode = #tpu.pipeline_mode<synchronous>, transform_indices = @transform_4, window_bounds = array<i64: 6, 50, 1>}, {pipeline_mode = #tpu.pipeline_mode<synchronous>, transform_indices = @transform_5, window_bounds = array<i64: 6, 50, 50>}, {pipeline_mode = #tpu.pipeline_mode<synchronous>, transform_indices = @transform_6, window_bounds = array<i64: 6, 50, 1>}, {pipeline_mode = #tpu.pipeline_mode<synchronous>, transform_indices = @transform_7, window_bounds = array<i64: 8, 50>}, {pipeline_mode = #tpu.pipeline_mode<synchronous>, transform_indices = @transform_8, window_bounds = array<i64: 8, 1>}, {transform_indices = @transform_9, window_bounds = array<i64: 8, 128>}]} {
    %c0 = arith.constant 0 : index
    %c0_0 = arith.constant 0 : index
    %0 = vector.load %arg1[%c0, %c0_0] : memref<2x128xf32, #tpu.memory_space<vmem>>, vector<2x128xf32>
    %c0_1 = arith.constant 0 : index
    %c0_2 = arith.constant 0 : index
    %1 = vector.load %arg2[%c0_1, %c0_2] : memref<50x2xf32, #tpu.memory_space<vmem>>, vector<50x2xf32>
    %2 = vector.extract_strided_slice %1 {offsets = [0, 0], sizes = [50, 1], strides = [1, 1]} : vector<50x2xf32> to vector<50x1xf32>
    %3 = vector.extract_strided_slice %0 {offsets = [0, 0], sizes = [1, 128], strides = [1, 1]} : vector<2x128xf32> to vector<1x128xf32>
    %4 = vector.broadcast %2 : vector<50x1xf32> to vector<50x128xf32>
    %5 = vector.broadcast %3 : vector<1x128xf32> to vector<50x128xf32>
    %6 = arith.mulf %4, %5 : vector<50x128xf32>
    %7 = vector.extract_strided_slice %1 {offsets = [0, 1], sizes = [50, 1], strides = [1, 1]} : vector<50x2xf32> to vector<50x1xf32>
    %8 = vector.extract_strided_slice %0 {offsets = [1, 0], sizes = [1, 128], strides = [1, 1]} : vector<2x128xf32> to vector<1x128xf32>
    %9 = vector.broadcast %7 : vector<50x1xf32> to vector<50x128xf32>
    %10 = vector.broadcast %8 : vector<1x128xf32> to vector<50x128xf32>
    %11 = arith.mulf %9, %10 : vector<50x128xf32>
    %12 = arith.addf %6, %11 : vector<50x128xf32>
    %c0_3 = arith.constant 0 : index
    %c0_4 = arith.constant 0 : index
    %13 = vector.load %arg3[%c0_3, %c0_4] : memref<50x1xf32, #tpu.memory_space<vmem>>, vector<50x1xf32>
    %14 = vector.broadcast %13 : vector<50x1xf32> to vector<50x128xf32>
    %15 = arith.addf %12, %14 : vector<50x128xf32>
    %cst = arith.constant 2.000000e+01 : f32
    %16 = vector.broadcast %cst : f32 to vector<50x128xf32>
    %17 = arith.minimumf %15, %16 : vector<50x128xf32>
    %18 = math.exp %17 : vector<50x128xf32>
    %cst_5 = arith.constant 2.000000e+00 : f32
    %19 = vector.broadcast %cst_5 : f32 to vector<50x128xf32>
    %20 = arith.addf %18, %19 : vector<50x128xf32>
    %21 = arith.mulf %18, %20 : vector<50x128xf32>
    %cst_6 = arith.constant 2.000000e+00 : f32
    %22 = vector.broadcast %cst_6 : f32 to vector<50x128xf32>
    %23 = arith.addf %21, %22 : vector<50x128xf32>
    %24 = tpu.reciprocal %23 {approx = true} : vector<50x128xf32> -> vector<50x128xf32>
    %cst_7 = arith.constant 2.000000e+01 : f32
    %25 = vector.broadcast %cst_7 : f32 to vector<50x128xf32>
    %26 = arith.cmpf ogt, %15, %25 : vector<50x128xf32>
    %27 = arith.mulf %15, %21 : vector<50x128xf32>
    %28 = arith.mulf %27, %24 : vector<50x128xf32>
    %29 = arith.select %26, %15, %28 : vector<50x128xi1>, vector<50x128xf32>
    %c0_8 = arith.constant 0 : index
    %c0_9 = arith.constant 0 : index
    %c0_10 = arith.constant 0 : index
    %30 = vector.load %arg4[%c0_8, %c0_9, %c0_10] : memref<6x50x50xbf16, #tpu.memory_space<vmem>>, vector<1x50x50xbf16>
    %31 = vector.shape_cast %30 : vector<1x50x50xbf16> to vector<50x50xbf16>
    %32 = arith.truncf %29 : vector<50x128xf32> to vector<50x128xbf16>
    %cst_11 = arith.constant dense<0.000000e+00> : vector<50x128xf32>
    %33 = tpu.matmul %31, %32, %cst_11 {dimension_numbers = #tpu.dot_dimension_numbers<[1], [0], [0], [1], [0, 0, 1, 1], [], []>} : vector<50x50xbf16>, vector<50x128xbf16>, vector<50x128xf32> -> vector<50x128xf32>
    %c0_12 = arith.constant 0 : index
    %c0_13 = arith.constant 0 : index
    %c0_14 = arith.constant 0 : index
    %34 = vector.load %arg5[%c0_12, %c0_13, %c0_14] : memref<6x50x1xf32, #tpu.memory_space<vmem>>, vector<1x50x1xf32>
    %35 = vector.shape_cast %34 : vector<1x50x1xf32> to vector<50x1xf32>
    %36 = vector.broadcast %35 : vector<50x1xf32> to vector<50x128xf32>
    %37 = arith.addf %33, %36 : vector<50x128xf32>
    %cst_15 = arith.constant 2.000000e+01 : f32
    %38 = vector.broadcast %cst_15 : f32 to vector<50x128xf32>
    %39 = arith.minimumf %37, %38 : vector<50x128xf32>
    %40 = math.exp %39 : vector<50x128xf32>
    %cst_16 = arith.constant 2.000000e+00 : f32
    %41 = vector.broadcast %cst_16 : f32 to vector<50x128xf32>
    %42 = arith.addf %40, %41 : vector<50x128xf32>
    %43 = arith.mulf %40, %42 : vector<50x128xf32>
    %cst_17 = arith.constant 2.000000e+00 : f32
    %44 = vector.broadcast %cst_17 : f32 to vector<50x128xf32>
    %45 = arith.addf %43, %44 : vector<50x128xf32>
    %46 = tpu.reciprocal %45 {approx = true} : vector<50x128xf32> -> vector<50x128xf32>
    %cst_18 = arith.constant 2.000000e+01 : f32
    %47 = vector.broadcast %cst_18 : f32 to vector<50x128xf32>
    %48 = arith.cmpf ogt, %37, %47 : vector<50x128xf32>
    %49 = arith.mulf %37, %43 : vector<50x128xf32>
    %50 = arith.mulf %49, %46 : vector<50x128xf32>
    %51 = arith.select %48, %37, %50 : vector<50x128xi1>, vector<50x128xf32>
    %c0_19 = arith.constant 0 : index
    %c0_20 = arith.constant 0 : index
    %c0_21 = arith.constant 0 : index
    %52 = vector.load %arg6[%c0_19, %c0_20, %c0_21] : memref<6x50x50xbf16, #tpu.memory_space<vmem>>, vector<1x50x50xbf16>
    %53 = vector.shape_cast %52 : vector<1x50x50xbf16> to vector<50x50xbf16>
    %54 = arith.truncf %51 : vector<50x128xf32> to vector<50x128xbf16>
    %cst_22 = arith.constant dense<0.000000e+00> : vector<50x128xf32>
    %55 = tpu.matmul %53, %54, %cst_22 {dimension_numbers = #tpu.dot_dimension_numbers<[1], [0], [0], [1], [0, 0, 1, 1], [], []>} : vector<50x50xbf16>, vector<50x128xbf16>, vector<50x128xf32> -> vector<50x128xf32>
    %56 = arith.addf %29, %55 : vector<50x128xf32>
    %c0_23 = arith.constant 0 : index
    %c0_24 = arith.constant 0 : index
    %c0_25 = arith.constant 0 : index
    %57 = vector.load %arg7[%c0_23, %c0_24, %c0_25] : memref<6x50x1xf32, #tpu.memory_space<vmem>>, vector<1x50x1xf32>
    %58 = vector.shape_cast %57 : vector<1x50x1xf32> to vector<50x1xf32>
    %59 = vector.broadcast %58 : vector<50x1xf32> to vector<50x128xf32>
    %60 = arith.addf %56, %59 : vector<50x128xf32>
    %c1 = arith.constant 1 : index
    %c0_26 = arith.constant 0 : index
    %c0_27 = arith.constant 0 : index
    %61 = vector.load %arg4[%c1, %c0_26, %c0_27] : memref<6x50x50xbf16, #tpu.memory_space<vmem>>, vector<1x50x50xbf16>
    %62 = vector.shape_cast %61 : vector<1x50x50xbf16> to vector<50x50xbf16>
    %63 = arith.truncf %60 : vector<50x128xf32> to vector<50x128xbf16>
    %cst_28 = arith.constant dense<0.000000e+00> : vector<50x128xf32>
    %64 = tpu.matmul %62, %63, %cst_28 {dimension_numbers = #tpu.dot_dimension_numbers<[1], [0], [0], [1], [0, 0, 1, 1], [], []>} : vector<50x50xbf16>, vector<50x128xbf16>, vector<50x128xf32> -> vector<50x128xf32>
    %c1_29 = arith.constant 1 : index
    %c0_30 = arith.constant 0 : index
    %c0_31 = arith.constant 0 : index
    %65 = vector.load %arg5[%c1_29, %c0_30, %c0_31] : memref<6x50x1xf32, #tpu.memory_space<vmem>>, vector<1x50x1xf32>
    %66 = vector.shape_cast %65 : vector<1x50x1xf32> to vector<50x1xf32>
    %67 = vector.broadcast %66 : vector<50x1xf32> to vector<50x128xf32>
    %68 = arith.addf %64, %67 : vector<50x128xf32>
    %cst_32 = arith.constant 2.000000e+01 : f32
    %69 = vector.broadcast %cst_32 : f32 to vector<50x128xf32>
    %70 = arith.minimumf %68, %69 : vector<50x128xf32>
    %71 = math.exp %70 : vector<50x128xf32>
    %cst_33 = arith.constant 2.000000e+00 : f32
    %72 = vector.broadcast %cst_33 : f32 to vector<50x128xf32>
    %73 = arith.addf %71, %72 : vector<50x128xf32>
    %74 = arith.mulf %71, %73 : vector<50x128xf32>
    %cst_34 = arith.constant 2.000000e+00 : f32
    %75 = vector.broadcast %cst_34 : f32 to vector<50x128xf32>
    %76 = arith.addf %74, %75 : vector<50x128xf32>
    %77 = tpu.reciprocal %76 {approx = true} : vector<50x128xf32> -> vector<50x128xf32>
    %cst_35 = arith.constant 2.000000e+01 : f32
    %78 = vector.broadcast %cst_35 : f32 to vector<50x128xf32>
    %79 = arith.cmpf ogt, %68, %78 : vector<50x128xf32>
    %80 = arith.mulf %68, %74 : vector<50x128xf32>
    %81 = arith.mulf %80, %77 : vector<50x128xf32>
    %82 = arith.select %79, %68, %81 : vector<50x128xi1>, vector<50x128xf32>
    %c1_36 = arith.constant 1 : index
    %c0_37 = arith.constant 0 : index
    %c0_38 = arith.constant 0 : index
    %83 = vector.load %arg6[%c1_36, %c0_37, %c0_38] : memref<6x50x50xbf16, #tpu.memory_space<vmem>>, vector<1x50x50xbf16>
    %84 = vector.shape_cast %83 : vector<1x50x50xbf16> to vector<50x50xbf16>
    %85 = arith.truncf %82 : vector<50x128xf32> to vector<50x128xbf16>
    %cst_39 = arith.constant dense<0.000000e+00> : vector<50x128xf32>
    %86 = tpu.matmul %84, %85, %cst_39 {dimension_numbers = #tpu.dot_dimension_numbers<[1], [0], [0], [1], [0, 0, 1, 1], [], []>} : vector<50x50xbf16>, vector<50x128xbf16>, vector<50x128xf32> -> vector<50x128xf32>
    %87 = arith.addf %60, %86 : vector<50x128xf32>
    %c1_40 = arith.constant 1 : index
    %c0_41 = arith.constant 0 : index
    %c0_42 = arith.constant 0 : index
    %88 = vector.load %arg7[%c1_40, %c0_41, %c0_42] : memref<6x50x1xf32, #tpu.memory_space<vmem>>, vector<1x50x1xf32>
    %89 = vector.shape_cast %88 : vector<1x50x1xf32> to vector<50x1xf32>
    %90 = vector.broadcast %89 : vector<50x1xf32> to vector<50x128xf32>
    %91 = arith.addf %87, %90 : vector<50x128xf32>
    %c2 = arith.constant 2 : index
    %c0_43 = arith.constant 0 : index
    %c0_44 = arith.constant 0 : index
    %92 = vector.load %arg4[%c2, %c0_43, %c0_44] : memref<6x50x50xbf16, #tpu.memory_space<vmem>>, vector<1x50x50xbf16>
    %93 = vector.shape_cast %92 : vector<1x50x50xbf16> to vector<50x50xbf16>
    %94 = arith.truncf %91 : vector<50x128xf32> to vector<50x128xbf16>
    %cst_45 = arith.constant dense<0.000000e+00> : vector<50x128xf32>
    %95 = tpu.matmul %93, %94, %cst_45 {dimension_numbers = #tpu.dot_dimension_numbers<[1], [0], [0], [1], [0, 0, 1, 1], [], []>} : vector<50x50xbf16>, vector<50x128xbf16>, vector<50x128xf32> -> vector<50x128xf32>
    %c2_46 = arith.constant 2 : index
    %c0_47 = arith.constant 0 : index
    %c0_48 = arith.constant 0 : index
    %96 = vector.load %arg5[%c2_46, %c0_47, %c0_48] : memref<6x50x1xf32, #tpu.memory_space<vmem>>, vector<1x50x1xf32>
    %97 = vector.shape_cast %96 : vector<1x50x1xf32> to vector<50x1xf32>
    %98 = vector.broadcast %97 : vector<50x1xf32> to vector<50x128xf32>
    %99 = arith.addf %95, %98 : vector<50x128xf32>
    %cst_49 = arith.constant 2.000000e+01 : f32
    %100 = vector.broadcast %cst_49 : f32 to vector<50x128xf32>
    %101 = arith.minimumf %99, %100 : vector<50x128xf32>
    %102 = math.exp %101 : vector<50x128xf32>
    %cst_50 = arith.constant 2.000000e+00 : f32
    %103 = vector.broadcast %cst_50 : f32 to vector<50x128xf32>
    %104 = arith.addf %102, %103 : vector<50x128xf32>
    %105 = arith.mulf %102, %104 : vector<50x128xf32>
    %cst_51 = arith.constant 2.000000e+00 : f32
    %106 = vector.broadcast %cst_51 : f32 to vector<50x128xf32>
    %107 = arith.addf %105, %106 : vector<50x128xf32>
    %108 = tpu.reciprocal %107 {approx = true} : vector<50x128xf32> -> vector<50x128xf32>
    %cst_52 = arith.constant 2.000000e+01 : f32
    %109 = vector.broadcast %cst_52 : f32 to vector<50x128xf32>
    %110 = arith.cmpf ogt, %99, %109 : vector<50x128xf32>
    %111 = arith.mulf %99, %105 : vector<50x128xf32>
    %112 = arith.mulf %111, %108 : vector<50x128xf32>
    %113 = arith.select %110, %99, %112 : vector<50x128xi1>, vector<50x128xf32>
    %c2_53 = arith.constant 2 : index
    %c0_54 = arith.constant 0 : index
    %c0_55 = arith.constant 0 : index
    %114 = vector.load %arg6[%c2_53, %c0_54, %c0_55] : memref<6x50x50xbf16, #tpu.memory_space<vmem>>, vector<1x50x50xbf16>
    %115 = vector.shape_cast %114 : vector<1x50x50xbf16> to vector<50x50xbf16>
    %116 = arith.truncf %113 : vector<50x128xf32> to vector<50x128xbf16>
    %cst_56 = arith.constant dense<0.000000e+00> : vector<50x128xf32>
    %117 = tpu.matmul %115, %116, %cst_56 {dimension_numbers = #tpu.dot_dimension_numbers<[1], [0], [0], [1], [0, 0, 1, 1], [], []>} : vector<50x50xbf16>, vector<50x128xbf16>, vector<50x128xf32> -> vector<50x128xf32>
    %118 = arith.addf %91, %117 : vector<50x128xf32>
    %c2_57 = arith.constant 2 : index
    %c0_58 = arith.constant 0 : index
    %c0_59 = arith.constant 0 : index
    %119 = vector.load %arg7[%c2_57, %c0_58, %c0_59] : memref<6x50x1xf32, #tpu.memory_space<vmem>>, vector<1x50x1xf32>
    %120 = vector.shape_cast %119 : vector<1x50x1xf32> to vector<50x1xf32>
    %121 = vector.broadcast %120 : vector<50x1xf32> to vector<50x128xf32>
    %122 = arith.addf %118, %121 : vector<50x128xf32>
    %c3 = arith.constant 3 : index
    %c0_60 = arith.constant 0 : index
    %c0_61 = arith.constant 0 : index
    %123 = vector.load %arg4[%c3, %c0_60, %c0_61] : memref<6x50x50xbf16, #tpu.memory_space<vmem>>, vector<1x50x50xbf16>
    %124 = vector.shape_cast %123 : vector<1x50x50xbf16> to vector<50x50xbf16>
    %125 = arith.truncf %122 : vector<50x128xf32> to vector<50x128xbf16>
    %cst_62 = arith.constant dense<0.000000e+00> : vector<50x128xf32>
    %126 = tpu.matmul %124, %125, %cst_62 {dimension_numbers = #tpu.dot_dimension_numbers<[1], [0], [0], [1], [0, 0, 1, 1], [], []>} : vector<50x50xbf16>, vector<50x128xbf16>, vector<50x128xf32> -> vector<50x128xf32>
    %c3_63 = arith.constant 3 : index
    %c0_64 = arith.constant 0 : index
    %c0_65 = arith.constant 0 : index
    %127 = vector.load %arg5[%c3_63, %c0_64, %c0_65] : memref<6x50x1xf32, #tpu.memory_space<vmem>>, vector<1x50x1xf32>
    %128 = vector.shape_cast %127 : vector<1x50x1xf32> to vector<50x1xf32>
    %129 = vector.broadcast %128 : vector<50x1xf32> to vector<50x128xf32>
    %130 = arith.addf %126, %129 : vector<50x128xf32>
    %cst_66 = arith.constant 2.000000e+01 : f32
    %131 = vector.broadcast %cst_66 : f32 to vector<50x128xf32>
    %132 = arith.minimumf %130, %131 : vector<50x128xf32>
    %133 = math.exp %132 : vector<50x128xf32>
    %cst_67 = arith.constant 2.000000e+00 : f32
    %134 = vector.broadcast %cst_67 : f32 to vector<50x128xf32>
    %135 = arith.addf %133, %134 : vector<50x128xf32>
    %136 = arith.mulf %133, %135 : vector<50x128xf32>
    %cst_68 = arith.constant 2.000000e+00 : f32
    %137 = vector.broadcast %cst_68 : f32 to vector<50x128xf32>
    %138 = arith.addf %136, %137 : vector<50x128xf32>
    %139 = tpu.reciprocal %138 {approx = true} : vector<50x128xf32> -> vector<50x128xf32>
    %cst_69 = arith.constant 2.000000e+01 : f32
    %140 = vector.broadcast %cst_69 : f32 to vector<50x128xf32>
    %141 = arith.cmpf ogt, %130, %140 : vector<50x128xf32>
    %142 = arith.mulf %130, %136 : vector<50x128xf32>
    %143 = arith.mulf %142, %139 : vector<50x128xf32>
    %144 = arith.select %141, %130, %143 : vector<50x128xi1>, vector<50x128xf32>
    %c3_70 = arith.constant 3 : index
    %c0_71 = arith.constant 0 : index
    %c0_72 = arith.constant 0 : index
    %145 = vector.load %arg6[%c3_70, %c0_71, %c0_72] : memref<6x50x50xbf16, #tpu.memory_space<vmem>>, vector<1x50x50xbf16>
    %146 = vector.shape_cast %145 : vector<1x50x50xbf16> to vector<50x50xbf16>
    %147 = arith.truncf %144 : vector<50x128xf32> to vector<50x128xbf16>
    %cst_73 = arith.constant dense<0.000000e+00> : vector<50x128xf32>
    %148 = tpu.matmul %146, %147, %cst_73 {dimension_numbers = #tpu.dot_dimension_numbers<[1], [0], [0], [1], [0, 0, 1, 1], [], []>} : vector<50x50xbf16>, vector<50x128xbf16>, vector<50x128xf32> -> vector<50x128xf32>
    %149 = arith.addf %122, %148 : vector<50x128xf32>
    %c3_74 = arith.constant 3 : index
    %c0_75 = arith.constant 0 : index
    %c0_76 = arith.constant 0 : index
    %150 = vector.load %arg7[%c3_74, %c0_75, %c0_76] : memref<6x50x1xf32, #tpu.memory_space<vmem>>, vector<1x50x1xf32>
    %151 = vector.shape_cast %150 : vector<1x50x1xf32> to vector<50x1xf32>
    %152 = vector.broadcast %151 : vector<50x1xf32> to vector<50x128xf32>
    %153 = arith.addf %149, %152 : vector<50x128xf32>
    %c4 = arith.constant 4 : index
    %c0_77 = arith.constant 0 : index
    %c0_78 = arith.constant 0 : index
    %154 = vector.load %arg4[%c4, %c0_77, %c0_78] : memref<6x50x50xbf16, #tpu.memory_space<vmem>>, vector<1x50x50xbf16>
    %155 = vector.shape_cast %154 : vector<1x50x50xbf16> to vector<50x50xbf16>
    %156 = arith.truncf %153 : vector<50x128xf32> to vector<50x128xbf16>
    %cst_79 = arith.constant dense<0.000000e+00> : vector<50x128xf32>
    %157 = tpu.matmul %155, %156, %cst_79 {dimension_numbers = #tpu.dot_dimension_numbers<[1], [0], [0], [1], [0, 0, 1, 1], [], []>} : vector<50x50xbf16>, vector<50x128xbf16>, vector<50x128xf32> -> vector<50x128xf32>
    %c4_80 = arith.constant 4 : index
    %c0_81 = arith.constant 0 : index
    %c0_82 = arith.constant 0 : index
    %158 = vector.load %arg5[%c4_80, %c0_81, %c0_82] : memref<6x50x1xf32, #tpu.memory_space<vmem>>, vector<1x50x1xf32>
    %159 = vector.shape_cast %158 : vector<1x50x1xf32> to vector<50x1xf32>
    %160 = vector.broadcast %159 : vector<50x1xf32> to vector<50x128xf32>
    %161 = arith.addf %157, %160 : vector<50x128xf32>
    %cst_83 = arith.constant 2.000000e+01 : f32
    %162 = vector.broadcast %cst_83 : f32 to vector<50x128xf32>
    %163 = arith.minimumf %161, %162 : vector<50x128xf32>
    %164 = math.exp %163 : vector<50x128xf32>
    %cst_84 = arith.constant 2.000000e+00 : f32
    %165 = vector.broadcast %cst_84 : f32 to vector<50x128xf32>
    %166 = arith.addf %164, %165 : vector<50x128xf32>
    %167 = arith.mulf %164, %166 : vector<50x128xf32>
    %cst_85 = arith.constant 2.000000e+00 : f32
    %168 = vector.broadcast %cst_85 : f32 to vector<50x128xf32>
    %169 = arith.addf %167, %168 : vector<50x128xf32>
    %170 = tpu.reciprocal %169 {approx = true} : vector<50x128xf32> -> vector<50x128xf32>
    %cst_86 = arith.constant 2.000000e+01 : f32
    %171 = vector.broadcast %cst_86 : f32 to vector<50x128xf32>
    %172 = arith.cmpf ogt, %161, %171 : vector<50x128xf32>
    %173 = arith.mulf %161, %167 : vector<50x128xf32>
    %174 = arith.mulf %173, %170 : vector<50x128xf32>
    %175 = arith.select %172, %161, %174 : vector<50x128xi1>, vector<50x128xf32>
    %c4_87 = arith.constant 4 : index
    %c0_88 = arith.constant 0 : index
    %c0_89 = arith.constant 0 : index
    %176 = vector.load %arg6[%c4_87, %c0_88, %c0_89] : memref<6x50x50xbf16, #tpu.memory_space<vmem>>, vector<1x50x50xbf16>
    %177 = vector.shape_cast %176 : vector<1x50x50xbf16> to vector<50x50xbf16>
    %178 = arith.truncf %175 : vector<50x128xf32> to vector<50x128xbf16>
    %cst_90 = arith.constant dense<0.000000e+00> : vector<50x128xf32>
    %179 = tpu.matmul %177, %178, %cst_90 {dimension_numbers = #tpu.dot_dimension_numbers<[1], [0], [0], [1], [0, 0, 1, 1], [], []>} : vector<50x50xbf16>, vector<50x128xbf16>, vector<50x128xf32> -> vector<50x128xf32>
    %180 = arith.addf %153, %179 : vector<50x128xf32>
    %c4_91 = arith.constant 4 : index
    %c0_92 = arith.constant 0 : index
    %c0_93 = arith.constant 0 : index
    %181 = vector.load %arg7[%c4_91, %c0_92, %c0_93] : memref<6x50x1xf32, #tpu.memory_space<vmem>>, vector<1x50x1xf32>
    %182 = vector.shape_cast %181 : vector<1x50x1xf32> to vector<50x1xf32>
    %183 = vector.broadcast %182 : vector<50x1xf32> to vector<50x128xf32>
    %184 = arith.addf %180, %183 : vector<50x128xf32>
    %c5 = arith.constant 5 : index
    %c0_94 = arith.constant 0 : index
    %c0_95 = arith.constant 0 : index
    %185 = vector.load %arg4[%c5, %c0_94, %c0_95] : memref<6x50x50xbf16, #tpu.memory_space<vmem>>, vector<1x50x50xbf16>
    %186 = vector.shape_cast %185 : vector<1x50x50xbf16> to vector<50x50xbf16>
    %187 = arith.truncf %184 : vector<50x128xf32> to vector<50x128xbf16>
    %cst_96 = arith.constant dense<0.000000e+00> : vector<50x128xf32>
    %188 = tpu.matmul %186, %187, %cst_96 {dimension_numbers = #tpu.dot_dimension_numbers<[1], [0], [0], [1], [0, 0, 1, 1], [], []>} : vector<50x50xbf16>, vector<50x128xbf16>, vector<50x128xf32> -> vector<50x128xf32>
    %c5_97 = arith.constant 5 : index
    %c0_98 = arith.constant 0 : index
    %c0_99 = arith.constant 0 : index
    %189 = vector.load %arg5[%c5_97, %c0_98, %c0_99] : memref<6x50x1xf32, #tpu.memory_space<vmem>>, vector<1x50x1xf32>
    %190 = vector.shape_cast %189 : vector<1x50x1xf32> to vector<50x1xf32>
    %191 = vector.broadcast %190 : vector<50x1xf32> to vector<50x128xf32>
    %192 = arith.addf %188, %191 : vector<50x128xf32>
    %cst_100 = arith.constant 2.000000e+01 : f32
    %193 = vector.broadcast %cst_100 : f32 to vector<50x128xf32>
    %194 = arith.minimumf %192, %193 : vector<50x128xf32>
    %195 = math.exp %194 : vector<50x128xf32>
    %cst_101 = arith.constant 2.000000e+00 : f32
    %196 = vector.broadcast %cst_101 : f32 to vector<50x128xf32>
    %197 = arith.addf %195, %196 : vector<50x128xf32>
    %198 = arith.mulf %195, %197 : vector<50x128xf32>
    %cst_102 = arith.constant 2.000000e+00 : f32
    %199 = vector.broadcast %cst_102 : f32 to vector<50x128xf32>
    %200 = arith.addf %198, %199 : vector<50x128xf32>
    %201 = tpu.reciprocal %200 {approx = true} : vector<50x128xf32> -> vector<50x128xf32>
    %cst_103 = arith.constant 2.000000e+01 : f32
    %202 = vector.broadcast %cst_103 : f32 to vector<50x128xf32>
    %203 = arith.cmpf ogt, %192, %202 : vector<50x128xf32>
    %204 = arith.mulf %192, %198 : vector<50x128xf32>
    %205 = arith.mulf %204, %201 : vector<50x128xf32>
    %206 = arith.select %203, %192, %205 : vector<50x128xi1>, vector<50x128xf32>
    %c5_104 = arith.constant 5 : index
    %c0_105 = arith.constant 0 : index
    %c0_106 = arith.constant 0 : index
    %207 = vector.load %arg6[%c5_104, %c0_105, %c0_106] : memref<6x50x50xbf16, #tpu.memory_space<vmem>>, vector<1x50x50xbf16>
    %208 = vector.shape_cast %207 : vector<1x50x50xbf16> to vector<50x50xbf16>
    %209 = arith.truncf %206 : vector<50x128xf32> to vector<50x128xbf16>
    %cst_107 = arith.constant dense<0.000000e+00> : vector<50x128xf32>
    %210 = tpu.matmul %208, %209, %cst_107 {dimension_numbers = #tpu.dot_dimension_numbers<[1], [0], [0], [1], [0, 0, 1, 1], [], []>} : vector<50x50xbf16>, vector<50x128xbf16>, vector<50x128xf32> -> vector<50x128xf32>
    %211 = arith.addf %184, %210 : vector<50x128xf32>
    %c5_108 = arith.constant 5 : index
    %c0_109 = arith.constant 0 : index
    %c0_110 = arith.constant 0 : index
    %212 = vector.load %arg7[%c5_108, %c0_109, %c0_110] : memref<6x50x1xf32, #tpu.memory_space<vmem>>, vector<1x50x1xf32>
    %213 = vector.shape_cast %212 : vector<1x50x1xf32> to vector<50x1xf32>
    %214 = vector.broadcast %213 : vector<50x1xf32> to vector<50x128xf32>
    %215 = arith.addf %211, %214 : vector<50x128xf32>
    %c0_111 = arith.constant 0 : index
    %c0_112 = arith.constant 0 : index
    %216 = vector.load %arg8[%c0_111, %c0_112] : memref<8x50xbf16, #tpu.memory_space<vmem>>, vector<8x50xbf16>
    %217 = arith.truncf %215 : vector<50x128xf32> to vector<50x128xbf16>
    %cst_113 = arith.constant dense<0.000000e+00> : vector<8x128xf32>
    %218 = tpu.matmul %216, %217, %cst_113 {dimension_numbers = #tpu.dot_dimension_numbers<[1], [0], [0], [1], [0, 0, 1, 1], [], []>} : vector<8x50xbf16>, vector<50x128xbf16>, vector<8x128xf32> -> vector<8x128xf32>
    %c0_114 = arith.constant 0 : index
    %c0_115 = arith.constant 0 : index
    %219 = vector.load %arg9[%c0_114, %c0_115] : memref<8x1xf32, #tpu.memory_space<vmem>>, vector<8x1xf32>
    %220 = vector.broadcast %219 : vector<8x1xf32> to vector<8x128xf32>
    %221 = arith.addf %218, %220 : vector<8x128xf32>
    %222 = tpu.iota {dimensions = array<i32: 0>} : vector<8x128xi32>
    %c0_i32 = arith.constant 0 : i32
    %223 = vector.broadcast %c0_i32 : i32 to vector<8x128xi32>
    %224 = arith.cmpi eq, %222, %223 : vector<8x128xi32>
    %c3_i32 = arith.constant 3 : i32
    %225 = vector.broadcast %c3_i32 : i32 to vector<8x128xi32>
    %226 = arith.cmpi eq, %222, %225 : vector<8x128xi32>
    %227 = arith.ori %224, %226 : vector<8x128xi1>
    %228 = math.exp %221 : vector<8x128xf32>
    %229 = arith.select %227, %228, %221 : vector<8x128xi1>, vector<8x128xf32>
    %c0_116 = arith.constant 0 : index
    %c0_117 = arith.constant 0 : index
    %230 = vector.load %arg10[%c0_116, %c0_117] : memref<8x128xf32, #tpu.memory_space<vmem>>, vector<8x128xf32>
    tpu.vector_store %arg10[%c0_116, %c0_117], %229 {strides = array<i32>} : memref<8x128xf32, #tpu.memory_space<vmem>>, vector<8x128xf32>,
    return
  }
  func.func @transform_0(%arg0: i32) -> (i32, i32) {
    %c0_i32 = arith.constant 0 : i32
    %c0_i32_0 = arith.constant 0 : i32
    return %c0_i32, %arg0 : i32, i32
  }
  func.func @transform_1(%arg0: i32) -> (i32, i32) {
    %c0_i32 = arith.constant 0 : i32
    %c0_i32_0 = arith.constant 0 : i32
    %c0_i32_1 = arith.constant 0 : i32
    return %c0_i32, %c0_i32_0 : i32, i32
  }
  func.func @transform_2(%arg0: i32) -> (i32, i32) {
    %c0_i32 = arith.constant 0 : i32
    %c0_i32_0 = arith.constant 0 : i32
    %c0_i32_1 = arith.constant 0 : i32
    return %c0_i32, %c0_i32_0 : i32, i32
  }
  func.func @transform_3(%arg0: i32) -> (i32, i32, i32) {
    %c0_i32 = arith.constant 0 : i32
    %c0_i32_0 = arith.constant 0 : i32
    %c0_i32_1 = arith.constant 0 : i32
    %c0_i32_2 = arith.constant 0 : i32
    return %c0_i32, %c0_i32_0, %c0_i32_1 : i32, i32, i32
  }
  func.func @transform_4(%arg0: i32) -> (i32, i32, i32) {
    %c0_i32 = arith.constant 0 : i32
    %c0_i32_0 = arith.constant 0 : i32
    %c0_i32_1 = arith.constant 0 : i32
    %c0_i32_2 = arith.constant 0 : i32
    return %c0_i32, %c0_i32_0, %c0_i32_1 : i32, i32, i32
  }
  func.func @transform_5(%arg0: i32) -> (i32, i32, i32) {
    %c0_i32 = arith.constant 0 : i32
    %c0_i32_0 = arith.constant 0 : i32
    %c0_i32_1 = arith.constant 0 : i32
    %c0_i32_2 = arith.constant 0 : i32
    return %c0_i32, %c0_i32_0, %c0_i32_1 : i32, i32, i32
  }
  func.func @transform_6(%arg0: i32) -> (i32, i32, i32) {
    %c0_i32 = arith.constant 0 : i32
    %c0_i32_0 = arith.constant 0 : i32
    %c0_i32_1 = arith.constant 0 : i32
    %c0_i32_2 = arith.constant 0 : i32
    return %c0_i32, %c0_i32_0, %c0_i32_1 : i32, i32, i32
  }
  func.func @transform_7(%arg0: i32) -> (i32, i32) {
    %c0_i32 = arith.constant 0 : i32
    %c0_i32_0 = arith.constant 0 : i32
    %c0_i32_1 = arith.constant 0 : i32
    return %c0_i32, %c0_i32_0 : i32, i32
  }
  func.func @transform_8(%arg0: i32) -> (i32, i32) {
    %c0_i32 = arith.constant 0 : i32
    %c0_i32_0 = arith.constant 0 : i32
    %c0_i32_1 = arith.constant 0 : i32
    return %c0_i32, %c0_i32_0 : i32, i32
  }
  func.func @transform_9(%arg0: i32) -> (i32, i32) {
    %c0_i32 = arith.constant 0 : i32
    %c0_i32_0 = arith.constant 0 : i32
    return %c0_i32, %arg0 : i32, i32
  }
}

</mosaic_0001>

<bundles_post_ra>
// kernel: tpu_custom_call.1
= control target key start
LH: loop header
LB: loop body
LE: loop exit
PB: predicated region body
PF: predicated region fallthrough
CT: control target
= control target key end

     0   :  { %v3547_v2 = vmov 1   ;;  %v3548_v6 = vmov 0   ;;  %s4630_s0 = inlined_call_operand.vmem [shape: f32[2,128], index: 0, kind: input, shape index: {}]   ;;  %s4631_s1 = inlined_call_operand.vmem [shape: f32[50,2], index: 1, kind: input, shape index: {}]   ;;  %s4632_s2 = inlined_call_operand.vmem [shape: f32[50,1], index: 2, kind: input, shape index: {}]   ;;  %s4633_s3 = inlined_call_operand.vmem [shape: bf16[6,50,50], index: 3, kind: input, shape index: {}]   ;;  %s4634_s4 = inlined_call_operand.vmem [shape: f32[6,50,1], index: 4, kind: input, shape index: {}]   ;;  %s4635_s5 = inlined_call_operand.vmem [shape: bf16[6,50,50], index: 5, kind: input, shape index: {}]   ;;  %s4636_s6 = inlined_call_operand.vmem [shape: f32[6,50,1], index: 6, kind: input, shape index: {}]   ;;  %s4637_s7 = inlined_call_operand.vmem [shape: bf16[8,50], index: 7, kind: input, shape index: {}]   ;;  %s4638_s8 = inlined_call_operand.vmem [shape: f32[8,1], index: 8, kind: input, shape index: {}]   ;;  %s4639_s9 = inlined_call_operand.hbm [shape: f32[8,128], index: 9, kind: output, shape index: {}]  }
   0x1   :  { %v37_v0 = vld [vmem:[%s4631_s1 + $0x10] sm:$0xff]  ;;  %v35_v1 = vld [vmem:[%s4631_s1] sm:$0xff]  ;;  %3269 = vset.pattern.permute.xlu0 %v3547_v2  ;;  %3267 = vset.pattern.permute.xlu1 %v3547_v2  ;;  %v36_v4 = vld [vmem:[%s4631_s1 + $0x8] sm:$0xff] }
   0x2   :  { %97 = vperm.xlu0 %3269, %v37_v0   ;;  %89 = vperm.xlu1 %3267, %v35_v1   ;;  %v39_v3 = vld [vmem:[%s4631_s1 + $0x20] sm:$0xff]  ;;  %v38_v5 = vld [vmem:[%s4631_s1 + $0x18] sm:$0xff]  ;;  %v135_v8 = vld [vmem:[%s4632_s2 + $0x8] sm:$0xff] }
   0x3   :  { %v134_v7 = vld [vmem:[%s4632_s2] sm:$0xff]  ;;  %v137_v9 = vld [vmem:[%s4632_s2 + $0x18] sm:$0xff]  ;;  %v40_v10 = vld [vmem:[%s4631_s1 + $0x28] sm:$0xff] }
   0x4   :  { %v138_v11 = vld [vmem:[%s4632_s2 + $0x20] sm:$0xff]  ;;  %v140_v12 = vld [vmem:[%s4632_s2 + $0x30] sm:$0x3]  ;;  %v272_v13 = vld [vmem:[%s4634_s4 + $0x8] sm:$0xff] }
   0x5   :  { %v136_v14 = vld [vmem:[%s4632_s2 + $0x10] sm:$0xff]  ;;  %v274_v15 = vld [vmem:[%s4634_s4 + $0x18] sm:$0xff]  ;;  %v276_v17 = vld [vmem:[%s4634_s4 + $0x28] sm:$0xff] }
   0x6   :  { %105 = vperm.xlu0 %3269, %v39_v3   ;;  %93 = vperm.xlu1 %3267, %v36_v4   ;;  %v41_v16 = vld [vmem:[%s4631_s1 + $0x30] sm:$0x3]  ;;  %v604_v18 = vld [vmem:[%s4636_s6] sm:$0xff]  ;;  %v139_v19 = vld [vmem:[%s4632_s2 + $0x28] sm:$0xff] }
   0x7   :  { %v606_v20 = vld [vmem:[%s4636_s6 + $0x10] sm:$0xff]  ;;  %v271_v21 = vld [vmem:[%s4634_s4] sm:$0xff] }
   0x8   :  { %v608_v22 = vld [vmem:[%s4636_s6 + $0x20] sm:$0xff] }
   0xa   :  { %3272 = vset.pattern.permute.xlu0 %v3548_v6  ;;  %3268 = vset.pattern.permute.xlu1 %v3548_v6 }
   0xb   :  { %44 = vperm.xlu0 %3272, %v35_v1   ;;  %59 = vperm.xlu1 %3268, %v38_v5  }
   0xf   :  { %49 = vperm.xlu0 %3272, %v36_v4   ;;  %3270 = vset.pattern.permute.xlu1 %v3547_v2 }
  0x10   :  { %101 = vperm.xlu1 %3270, %v38_v5  }
  0x13   :  { %54 = vperm.xlu0 %3272, %v37_v0  }
  0x14   :  { %3271 = vset.pattern.permute.xlu1 %v3548_v6 }
  0x15   :  { %143 = vperm.xlu1 %3271, %v134_v7  }
  0x17   :  { %148 = vperm.xlu0 %3272, %v135_v8  }
  0x19   :  { %64 = vperm.xlu1 %3271, %v39_v3  }
  0x1b   :  { %158 = vperm.xlu0 %3272, %v137_v9  }
  0x1d   :  { %69 = vperm.xlu1 %3271, %v40_v10  }
  0x1f   :  { %163 = vperm.xlu0 %3272, %v138_v11  }
  0x21   :  { %3273 = vset.pattern.permute.xlu1 %v3547_v2 }
  0x22   :  { %109 = vperm.xlu1 %3273, %v40_v10  }
  0x23   :  { %173 = vperm.xlu0 %3272, %v140_v12  }
  0x26   :  { %3274 = vset.pattern.permute.xlu1 %v3548_v6 }
  0x27   :  { %285 = vperm.xlu0 %3272, %v272_v13   ;;  %153 = vperm.xlu1 %3274, %v136_v14  }
  0x2b   :  { %295 = vperm.xlu0 %3272, %v274_v15   ;;  %74 = vperm.xlu1 %3274, %v41_v16  }
  0x2f   :  { %305 = vperm.xlu0 %3272, %v276_v17   ;;  %3275 = vset.pattern.permute.xlu1 %v3547_v2 }
  0x30   :  { %113 = vperm.xlu1 %3275, %v41_v16  }
  0x33   :  { %613 = vperm.xlu0 %3272, %v604_v18  }
  0x34   :  { %3276 = vset.pattern.permute.xlu1 %v3548_v6 }
  0x35   :  { %168 = vperm.xlu1 %3276, %v139_v19  }
  0x37   :  { %623 = vperm.xlu0 %3272, %v606_v20  }
  0x38   :  { %14 = vsyncpa [#allocation3], 0  ;;  %v273_v23 = vld [vmem:[%s4634_s4 + $0x10] sm:$0xff]  ;;  %v275_v25 = vld [vmem:[%s4634_s4 + $0x20] sm:$0xff]  ;;  %vm331_vm0 = vcmask 408576   ;;  %v77_v60 = vlaneseq  ;;  %vm344_vm8 = vcmask 1040384  }
  0x39   :  { %280 = vperm.xlu1 %3276, %v271_v21   ;;  %v610_v24 = vld [vmem:[%s4636_s6 + $0x30] sm:$0x3]  ;;  %v2732_v26 = vld [vmem:[%s4634_s4 + $0x40] sm:$0xff]  ;;  %v605_v29 = vld [vmem:[%s4636_s6 + $0x8] sm:$0xff]  ;;  %s3551_s12 = smov [#allocation2]  }
  0x3a   :  { %v277_v27 = vld [vmem:[%s4634_s4 + $0x30] sm:$0x3]  ;;  %v2736_v30 = vld [vmem:[%s4634_s4 + $0x60] sm:$0xff]  ;;  %v607_v31 = vld [vmem:[%s4636_s6 + $0x18] sm:$0xff]  ;;  %v3785_v1 = vshrl.u32 %v77_v60, 7  ;;  %s2700_s13 = sshll.u32 %s3551_s12, 4  ;;  %s2701_s13 = int_to_ptr.vmem [resolvable:$true] %s2700_s13 }
  0x3b   :  { %633 = vperm.xlu0 %3272, %v608_v22   ;;  %v2734_v28 = vld [vmem:[%s4634_s4 + $0x50] sm:$0xff]  ;;  %v2761_v32 = vld [vmem:[%s4636_s6 + $0x38] sm:$0xff]  ;;  %v609_v33 = vld [vmem:[%s4636_s6 + $0x28] sm:$0xff]  ;;  %p3528_p1 = scmp.lt.s32.totalorder %s2701_s13, %s2701_s13 }
  0x3c   :  { %v2763_v34 = vld [vmem:[%s4636_s6 + $0x48] sm:$0xff]  ;;  %v2731_v35 = vld [vmem:[%s4634_s4 + $0x38] sm:$0xff]  ;;  %v3277_v43 = vld [vmem:[%s4633_s3] sm:$0xff]   ;;  %v79_v5 = vsub.s32 0, %v3785_v1  ;;  %v118_v7 = vsub.s32 1, %v3785_v1 }
  0x3d   :  { %290 = vperm.xlu1 %3276, %v273_v23   ;;  %v2765_v36 = vld [vmem:[%s4636_s6 + $0x58] sm:$0xff]  ;;  %v2733_v37 = vld [vmem:[%s4634_s4 + $0x48] sm:$0xff]  ;;  %v2762_v44 = vld [vmem:[%s4636_s6 + $0x40] sm:$0xff]  ;;  %3054 = vmatprep.mubr.msk.bf16.mxu0 %vm331_vm0, %v3277_v43 }
  0x3e   :  { %v2767_v38 = vld [vmem:[%s4636_s6 + $0x68] sm:$0x3]  ;;  %v2735_v39 = vld [vmem:[%s4634_s4 + $0x58] sm:$0xff]  ;;  %v2764_v46 = vld [vmem:[%s4636_s6 + $0x50] sm:$0xff] }
  0x3f   :  { %643 = vperm.xlu0 %3272, %v610_v24   ;;  %v2776_v40 = vld [vmem:[%s4634_s4 + $0x78] sm:$0xff]  ;;  %v2737_v41 = vld [vmem:[%s4634_s4 + $0x68] sm:$0x3]  ;;  %v2805_v47 = vld [vmem:[%s4636_s6 + $0x70] sm:$0xff] }
  0x40   :  { %v2778_v42 = vld [vmem:[%s4634_s4 + $0x88] sm:$0xff]  ;;  %v2780_v45 = vld [vmem:[%s4634_s4 + $0x98] sm:$0xff]  ;;  %v2766_v48 = vld [vmem:[%s4636_s6 + $0x60] sm:$0xff] }
  0x41   :  { %300 = vperm.xlu1 %3276, %v275_v25   ;;  %v2807_v49 = vld [vmem:[%s4636_s6 + $0x80] sm:$0xff]  ;;  %v2775_v50 = vld [vmem:[%s4634_s4 + $0x70] sm:$0xff]  ;;  %v2806_v58 = vld [vmem:[%s4636_s6 + $0x78] sm:$0xff] }
  0x42   :  { %v2809_v51 = vld [vmem:[%s4636_s6 + $0x90] sm:$0xff]  ;;  %v2777_v52 = vld [vmem:[%s4634_s4 + $0x80] sm:$0xff]  ;;  %v2808_v63 = vld [vmem:[%s4636_s6 + $0x88] sm:$0xff] }
  0x43   :  { %680 = vperm.xlu0 %3272, %v2732_v26   ;;  %v2811_v53 = vld [vmem:[%s4636_s6 + $0xa0] sm:$0x3]  ;;  %v2779_v54 = vld [vmem:[%s4634_s4 + $0x90] sm:$0xff]  ;;  %v2849_v0 = vld [vmem:[%s4636_s6 + $0xa8] sm:$0xff] }
  0x44   :  { %v2820_v55 = vld [vmem:[%s4634_s4 + $0xb0] sm:$0xff]  ;;  %v2781_v56 = vld [vmem:[%s4634_s4 + $0xa0] sm:$0x3]  ;;  %v2810_v4 = vld [vmem:[%s4636_s6 + $0x98] sm:$0xff] }
  0x45   :  { %310 = vperm.xlu1 %3276, %v277_v27   ;;  %v2822_v57 = vld [vmem:[%s4634_s4 + $0xc0] sm:$0xff]  ;;  %v2824_v59 = vld [vmem:[%s4634_s4 + $0xd0] sm:$0xff]  ;;  %v2851_v6 = vld [vmem:[%s4636_s6 + $0xb8] sm:$0xff] }
  0x46   :  { %v34_v8 = vld [vmem:[%s4630_s0] sm:$0x3]  ;;  %v2819_v11 = vld [vmem:[%s4634_s4 + $0xa8] sm:$0xff]  ;;  %v2821_v16 = vld [vmem:[%s4634_s4 + $0xb8] sm:$0xff] }
  0x47   :  { %690 = vperm.xlu0 %3272, %v2734_v28   ;;  %v3801_v12 = vrot.slane %v34_v8, %v79_v5  ;;  %v2853_v13 = vld [vmem:[%s4636_s6 + $0xc8] sm:$0xff]  ;;  %v3806_v14 = vrot.slane %v34_v8, %v118_v7  ;;  %v2855_v19 = vld [vmem:[%s4636_s6 + $0xd8] sm:$0x3]  ;;  %v2895_v60 = vld [vmem:[%s4636_s6 + $0xf0] sm:$0xff] }
  0x48   :  { %v2823_v23 = vld [vmem:[%s4634_s4 + $0xc8] sm:$0xff]  ;;  %v2897_v7 = vld [vmem:[%s4636_s6 + $0x100] sm:$0xff] }
  0x49   :  { %618 = vperm.xlu1 %3276, %v605_v29   ;;  %v2864_v27 = vld [vmem:[%s4634_s4 + $0xe8] sm:$0xff] }
  0x4b   :  { %700 = vperm.xlu0 %3272, %v2736_v30  }
  0x4d   :  { %628 = vperm.xlu1 %3276, %v607_v31  }
  0x4f   :  { %1008 = vperm.xlu0 %3272, %v2761_v32   ;;  %v2825_v32 = vld [vmem:[%s4634_s4 + $0xd8] sm:$0x3] }
  0x51   :  { %638 = vperm.xlu1 %3276, %v609_v33  }
  0x53   :  { %1018 = vperm.xlu0 %3272, %v2763_v34  }
  0x55   :  { %675 = vperm.xlu1 %3276, %v2731_v35  }
  0x57   :  { %1028 = vperm.xlu0 %3272, %v2765_v36  }
  0x59   :  { %685 = vperm.xlu1 %3276, %v2733_v37   ;;  %v2866_v37 = vld [vmem:[%s4634_s4 + $0xf8] sm:$0xff] }
  0x5b   :  { %1038 = vperm.xlu0 %3272, %v2767_v38  }
  0x5d   :  { %695 = vperm.xlu1 %3276, %v2735_v39  }
  0x5f   :  { %1075 = vperm.xlu0 %3272, %v2776_v40  }
  0x61   :  { %705 = vperm.xlu1 %3276, %v2737_v41  }
  0x63   :  { %1085 = vperm.xlu0 %3272, %v2778_v42   ;;  %v2850_v42 = vld [vmem:[%s4636_s6 + $0xb0] sm:$0xff] }
  0x65   :  { %1013 = vperm.xlu1 %3276, %v2762_v44  }
  0x67   :  { %1095 = vperm.xlu0 %3272, %v2780_v45  }
  0x69   :  { %1023 = vperm.xlu1 %3276, %v2764_v46   ;;  %v2868_v46 = vld [vmem:[%s4634_s4 + $0x108] sm:$0xff] }
  0x6b   :  { %1403 = vperm.xlu0 %3272, %v2805_v47  }
  0x6d   :  { %1033 = vperm.xlu1 %3276, %v2766_v48  }
  0x6f   :  { %1413 = vperm.xlu0 %3272, %v2807_v49  }
  0x71   :  { %1070 = vperm.xlu1 %3276, %v2775_v50   ;;  %v2852_v50 = vld [vmem:[%s4636_s6 + $0xc0] sm:$0xff] }
  0x73   :  { %1423 = vperm.xlu0 %3272, %v2809_v51  }
  0x75   :  { %1080 = vperm.xlu1 %3276, %v2777_v52  }
  0x77   :  { %1433 = vperm.xlu0 %3272, %v2811_v53   ;;  %v2893_v53 = vld [vmem:[%s4636_s6 + $0xe0] sm:$0xff] }
  0x79   :  { %1090 = vperm.xlu1 %3276, %v2779_v54  }
  0x7b   :  { %1470 = vperm.xlu0 %3272, %v2820_v55  }
  0x7d   :  { %1100 = vperm.xlu1 %3276, %v2781_v56  }
  0x7f   :  { %1480 = vperm.xlu0 %3272, %v2822_v57  }
  0x81   :  { %1408 = vperm.xlu1 %3276, %v2806_v58   ;;  %v90_v61 = vpop.permute.xlu1 %89  ;;  %v3777_v62 = vpop.permute.xlu0 %97  ;;  %v2854_v58 = vld [vmem:[%s4636_s6 + $0xd0] sm:$0xff] }
  0x82   :  { %v120_v20 = vmul.f32 %v3806_v14, %v90_v61  ;;  %v122_v54 = vmul.f32 %v3806_v14, %v3777_v62 }
  0x83   :  { %1490 = vperm.xlu0 %3272, %v2824_v59  }
  0x85   :  { %1418 = vperm.xlu1 %3276, %v2808_v63   ;;  %v94_v2 = vpop.permute.xlu1 %93  ;;  %v106_v3 = vpop.permute.xlu0 %105 }
  0x86   :  { %v121_v24 = vmul.f32 %v3806_v14, %v94_v2  ;;  %v124_v47 = vmul.f32 %v3806_v14, %v106_v3 }
  0x87   :  { %1798 = vperm.xlu0 %3272, %v2849_v0   ;;  %v2863_v0 = vld [vmem:[%s4634_s4 + $0xe0] sm:$0xff] }
  0x89   :  { %1428 = vperm.xlu1 %3276, %v2810_v4  }
  0x8a   :  { %v45_v9 = vpop.permute.xlu0 %44  ;;  %v60_v10 = vpop.permute.xlu1 %59 }
  0x8b   :  { %1808 = vperm.xlu0 %3272, %v2851_v6   ;;  %v81_v17 = vmul.f32 %v3801_v12, %v45_v9  ;;  %v84_v33 = vmul.f32 %v3801_v12, %v60_v10 }
  0x8d   :  { %1465 = vperm.xlu1 %3276, %v2819_v11   ;;  %v127_v25 = vadd.f32 %v120_v20, %v81_v17  ;;  %v2899_v20 = vld [vmem:[%s4636_s6 + $0x110] sm:$0x3] }
  0x8e   :  { %v50_v15 = vpop.permute.xlu0 %49 }
  0x8f   :  { %1818 = vperm.xlu0 %3272, %v2853_v13   ;;  %v102_v18 = vpop.permute.xlu1 %101  ;;  %v82_v21 = vmul.f32 %v3801_v12, %v50_v15  ;;  %v2865_v13 = vld [vmem:[%s4634_s4 + $0xf0] sm:$0xff] }
  0x90   :  { %v123_v28 = vmul.f32 %v3806_v14, %v102_v18 }
  0x91   :  { %1475 = vperm.xlu1 %3276, %v2821_v16   ;;  %v128_v30 = vadd.f32 %v121_v24, %v82_v21 }
  0x92   :  { %v55_v22 = vpop.permute.xlu0 %54  ;;  %v130_v40 = vadd.f32 %v123_v28, %v84_v33 }
  0x93   :  { %1828 = vperm.xlu0 %3272, %v2855_v19   ;;  %v83_v55 = vmul.f32 %v3801_v12, %v55_v22  ;;  %v2867_v22 = vld [vmem:[%s4634_s4 + $0x100] sm:$0xff] }
  0x94   :  { %v144_v26 = vpop.permute.xlu1 %143 }
  0x95   :  { %v3825_v29 = vadd.f32 %v144_v26, %v127_v25  ;;  %1485 = vperm.xlu1 %3276, %v2823_v23   ;;  %v129_v62 = vadd.f32 %v122_v54, %v83_v55 }
  0x96   :  { %v149_v31 = vpop.permute.xlu0 %148 }
  0x97   :  { %v183_v34 = vmin.f32 %v3825_v29, 20.0  ;;  %v3832_v35 = vadd.f32 %v149_v31, %v128_v30  ;;  %1865 = vperm.xlu0 %3272, %v2864_v27   ;;  %v2908_v27 = vld [vmem:[%s4634_s4 + $0x120] sm:$0xff]  ;;  %vm232_vm1 = vcmp.gt.f32.partialorder %v3825_v29, 20.0 }
  0x98   :  { %v65_v36 = vpop.permute.xlu1 %64 }
  0x99   :  { %v190_v38 = vmul.f32 1.442695, %v183_v34  ;;  %v184_v39 = vmin.f32 %v3832_v35, 20.0  ;;  %1495 = vperm.xlu1 %3276, %v2825_v32   ;;  %v85_v48 = vmul.f32 %v3801_v12, %v65_v36  ;;  %v2869_v32 = vld [vmem:[%s4634_s4 + $0x110] sm:$0x3]  ;;  %vm233_vm2 = vcmp.gt.f32.partialorder %v3832_v35, 20.0 }
  0x9a   :  { %v159_v41 = vpop.permute.xlu0 %158 }
  0x9b   :  { %3325 = vpow2.f32 %v190_v38  ;;  %v192_v43 = vmul.f32 1.442695, %v184_v39  ;;  %v3841_v44 = vadd.f32 %v159_v41, %v130_v40  ;;  %1875 = vperm.xlu0 %3272, %v2866_v37   ;;  %v131_v56 = vadd.f32 %v124_v47, %v85_v48 }
  0x9c   :  { %v70_v45 = vpop.permute.xlu1 %69 }
  0x9d   :  { %3327 = vpow2.f32 %v192_v43  ;;  %v186_v49 = vmin.f32 %v3841_v44, 20.0  ;;  %1803 = vperm.xlu1 %3276, %v2850_v42   ;;  %v86_v30 = vmul.f32 %v3801_v12, %v70_v45  ;;  %v2894_v42 = vld [vmem:[%s4636_s6 + $0xe8] sm:$0xff]  ;;  %vm235_vm4 = vcmp.gt.f32.partialorder %v3841_v44, 20.0 }
  0x9e   :  { %v164_v52 = vpop.permute.xlu0 %163 }
  0x9f   :  { %v196_v51 = vmul.f32 1.442695, %v186_v49  ;;  %1885 = vperm.xlu0 %3272, %v2868_v46   ;;  %v3861_v59 = vadd.f32 %v164_v52, %v131_v56  ;;  %v2896_v56 = vld [vmem:[%s4636_s6 + $0xf8] sm:$0xff] }
  0xa1   :  { %3329 = vpow2.f32 %v196_v51  ;;  %1813 = vperm.xlu1 %3276, %v2852_v50   ;;  %v110_v57 = vpop.permute.xlu1 %109  ;;  %v187_v4 = vmin.f32 %v3861_v59, 20.0  ;;  %v2912_v51 = vld [vmem:[%s4634_s4 + $0x140] sm:$0xff]  ;;  %vm236_vm5 = vcmp.gt.f32.partialorder %v3861_v59, 20.0 }
  0xa2   :  { %v125_v23 = vmul.f32 %v3806_v14, %v110_v57  ;;  %v174_v33 = vpop.permute.xlu0 %173 }
  0xa3   :  { %2193 = vperm.xlu0 %3272, %v2893_v53   ;;  %v198_v17 = vmul.f32 1.442695, %v187_v4 }
  0xa4   :  { %v132_v34 = vadd.f32 %v125_v23, %v86_v30 }
  0xa5   :  { %v3326_v61 = vpop.eup %3325  ;;  %1823 = vperm.xlu1 %3276, %v2854_v58  }
  0xa6   :  { %v154_v63 = vpop.permute.xlu1 %153  ;;  %v204_v2 = vadd.f32 2.0, %v3326_v61 }
  0xa7   :  { %v3328_v3 = vpop.eup %3327  ;;  %v3870_v5 = vadd.f32 %v154_v63, %v129_v62  ;;  %2203 = vperm.xlu0 %3272, %v2895_v60   ;;  %v2937_v63 = vld [vmem:[%s4636_s6 + $0x118] sm:$0xff] }
  0xa8   :  { %v205_v6 = vadd.f32 2.0, %v3328_v3  ;;  %v211_v8 = vmul.f32 %v3326_v61, %v204_v2  ;;  %v2907_v2 = vld [vmem:[%s4634_s4 + $0x118] sm:$0xff] }
  0xa9   :  { %v185_v9 = vmin.f32 %v3870_v5, 20.0  ;;  %1860 = vperm.xlu1 %3276, %v2863_v0   ;;  %v2939_v0 = vld [vmem:[%s4636_s6 + $0x128] sm:$0xff]  ;;  %vm234_vm3 = vcmp.gt.f32.partialorder %v3870_v5, 20.0 }
  0xaa   :  { %v212_v10 = vmul.f32 %v3328_v3, %v205_v6  ;;  %v75_v11 = vpop.permute.xlu1 %74  ;;  %v218_v15 = vadd.f32 2.0, %v211_v8 }
  0xab   :  { %v3330_v16 = vpop.eup %3329  ;;  %v194_v18 = vmul.f32 1.442695, %v185_v9  ;;  %2213 = vperm.xlu0 %3272, %v2897_v7   ;;  %v87_v25 = vmul.f32 %v3801_v12, %v75_v11  ;;  %v239_v12 = vmul.f32 %v211_v8, %v3825_v29  ;;  %v2941_v7 = vld [vmem:[%s4636_s6 + $0x138] sm:$0xff] }
  0xac   :  { %v219_v19 = vadd.f32 2.0, %v212_v10  ;;  %3331 = vrcp.f32 %v218_v15  ;;  %v207_v21 = vadd.f32 2.0, %v3330_v16  ;;  %v240_v45 = vmul.f32 %v212_v10, %v3832_v35 }
  0xad   :  { %3333 = vpow2.f32 %v194_v18  ;;  %1870 = vperm.xlu1 %3276, %v2865_v13   ;;  %v2909_v13 = vld [vmem:[%s4634_s4 + $0x128] sm:$0xff] }
  0xae   :  { %3335 = vrcp.f32 %v219_v19  ;;  %v214_v28 = vmul.f32 %v3330_v16, %v207_v21 }
  0xaf   :  { %3337 = vpow2.f32 %v198_v17  ;;  %2223 = vperm.xlu0 %3272, %v2899_v20   ;;  %v114_v24 = vpop.permute.xlu1 %113  ;;  %v2943_v20 = vld [vmem:[%s4636_s6 + $0x148] sm:$0x3] }
  0xb0   :  { %v126_v26 = vmul.f32 %v3806_v14, %v114_v24  ;;  %v2910_v14 = vld [vmem:[%s4634_s4 + $0x130] sm:$0xff]  ;;  %v221_v38 = vadd.f32 2.0, %v214_v28  ;;  %v242_v9 = vmul.f32 %v214_v28, %v3841_v44  ;;  %v2911_v24 = vld [vmem:[%s4634_s4 + $0x138] sm:$0xff]  ;;  %v2913_v28 = vld [vmem:[%s4634_s4 + $0x148] sm:$0x3] }
  0xb1   :  { %1880 = vperm.xlu1 %3276, %v2867_v22  }
  0xb2   :  { %v133_v31 = vadd.f32 %v126_v26, %v87_v25  ;;  %3339 = vrcp.f32 %v221_v38 }
  0xb3   :  { %2260 = vperm.xlu0 %3272, %v2908_v27  }
  0xb4   :  { %v3895_v36 = vadd.f32 %v174_v33, %v133_v31  ;;  %v169_v37 = vpop.permute.xlu1 %168 }
  0xb5   :  { %v3900_v39 = vadd.f32 %v169_v37, %v132_v34  ;;  %1890 = vperm.xlu1 %3276, %v2869_v32  }
  0xb6   :  { %v3332_v40 = vpop.eup %3331  ;;  %v189_v41 = vmin.f32 %v3895_v36, 20.0  ;;  %vm238_vm7 = vcmp.gt.f32.partialorder %v3895_v36, 20.0 }
  0xb7   :  { %v3334_v43 = vpop.eup %3333  ;;  %v188_v46 = vmin.f32 %v3900_v39, 20.0  ;;  %2270 = vperm.xlu0 %3272, %v2910_v14   ;;  %v246_v47 = vmul.f32 %v3332_v40, %v239_v12  ;;  %v2940_v14 = vld [vmem:[%s4636_s6 + $0x130] sm:$0xff]  ;;  %vm237_vm6 = vcmp.gt.f32.partialorder %v3900_v39, 20.0 }
  0xb8   :  { %v3336_v48 = vpop.eup %3335  ;;  %v206_v49 = vadd.f32 2.0, %v3334_v43  ;;  %v202_v50 = vmul.f32 1.442695, %v189_v41 }
  0xb9   :  { %v3338_v52 = vpop.eup %3337  ;;  %v200_v53 = vmul.f32 1.442695, %v188_v46  ;;  %2198 = vperm.xlu1 %3276, %v2894_v42   ;;  %v247_v54 = vmul.f32 %v3336_v48, %v240_v45  ;;  %v3918_v57 = vsel %vm232_vm1, %v3825_v29, %v246_v47  ;;  %v2898_v29 = vld [vmem:[%s4636_s6 + $0x108] sm:$0xff]  ;;  %v2942_v45 = vld [vmem:[%s4636_s6 + $0x140] sm:$0xff]  ;;  %v3279_v47 = vld [vmem:[%s4633_s3 + $0x10] sm:$0xff]  }
  0xba   :  { %v213_v55 = vmul.f32 %v3334_v43, %v206_v49  ;;  %3341 = vpow2.f32 %v202_v50  ;;  %v208_v60 = vadd.f32 2.0, %v3338_v52  ;;  %v3280_v48 = vld [vmem:[%s4633_s3 + $0x18] ss:$0 sps:$4 sm:$0x11]   ;;  %v3281_v49 = vld [vmem:[%s4635_s5] sm:$0xff]   ;;  %v281_v50 = vpop.permute.xlu1 %280 }
  0xbb   :  { %3343 = vpow2.f32 %v200_v53  ;;  %2280 = vperm.xlu0 %3272, %v2912_v51   ;;  %v3921_v58 = vsel %vm233_vm2, %v3832_v35, %v247_v54  ;;  %3070 = vmatprep.mubr.msk.bf16.mxu1 %vm331_vm0, %v3281_v49  ;;  %v286_v51 = vpop.permute.xlu0 %285 }
  0xbc   :  { %v220_v61 = vadd.f32 2.0, %v213_v55  ;;  %v267_v62 = vpack.c.bf16 %v3921_v58, %v3918_v57  ;;  %v215_v35 = vmul.f32 %v3338_v52, %v208_v60  ;;  %v3340_v3 = vpop.eup %3339  ;;  %v241_v15 = vmul.f32 %v213_v55, %v3870_v5 }
  0xbd   :  { %2208 = vperm.xlu1 %3276, %v2896_v56   ;;  %v249_v17 = vmul.f32 %v3340_v3, %v242_v9 }
  0xbe   :  { %3345 = vrcp.f32 %v220_v61  ;;  %3046 = vmatprep.subr.bf16.mxu0 %v267_v62  ;;  %v222_v6 = vadd.f32 2.0, %v215_v35  ;;  %v291_v52 = vpop.permute.xlu1 %290 }
  0xbf   :  { %2588 = vperm.xlu0 %3272, %v2937_v63   ;;  %3047 = vmatpush3.bf16.msra.mxu0 %v267_v62  ;;  %v3957_v26 = vsel %vm235_vm4, %v3841_v44, %v249_v17  ;;  %v243_v44 = vmul.f32 %v215_v35, %v3861_v59  ;;  %v296_v54 = vpop.permute.xlu0 %295 }
  0xc0   :  { %3347 = vrcp.f32 %v222_v6 }
  0xc1   :  { %2218 = vperm.xlu1 %3276, %v2898_v29  }
  0xc2   :  { %v301_v60 = vpop.permute.xlu1 %300 }
  0xc3   :  { %2598 = vperm.xlu0 %3272, %v2939_v0  }
  0xc4   :  { %v3342_v4 = vpop.eup %3341 }
  0xc5   :  { %v3344_v8 = vpop.eup %3343  ;;  %v210_v10 = vadd.f32 2.0, %v3342_v4  ;;  %2255 = vperm.xlu1 %3276, %v2907_v2  }
  0xc6   :  { %v209_v11 = vadd.f32 2.0, %v3344_v8  ;;  %v311_v9 = vpop.permute.xlu1 %310 }
  0xc7   :  { %v217_v16 = vmul.f32 %v3342_v4, %v210_v10  ;;  %2608 = vperm.xlu0 %3272, %v2941_v7  }
  0xc8   :  { %v3346_v18 = vpop.eup %3345  ;;  %v216_v19 = vmul.f32 %v3344_v8, %v209_v11 }
  0xc9   :  { %v224_v21 = vadd.f32 2.0, %v217_v16  ;;  %2265 = vperm.xlu1 %3276, %v2909_v13   ;;  %v248_v22 = vmul.f32 %v3346_v18, %v241_v15  ;;  %v245_v31 = vmul.f32 %v217_v16, %v3895_v36  ;;  %v306_v18 = vpop.permute.xlu0 %305 }
  0xca   :  { %v223_v23 = vadd.f32 2.0, %v216_v19  ;;  %v3348_v30 = vpop.eup %3347  ;;  %v244_v33 = vmul.f32 %v216_v19, %v3900_v39 }
  0xcb   :  { %3349 = vrcp.f32 %v224_v21  ;;  %2618 = vperm.xlu0 %3272, %v2943_v20   ;;  %v3954_v25 = vsel %vm234_vm3, %v3870_v5, %v248_v22  ;;  %v2938_v5 = vld [vmem:[%s4636_s6 + $0x120] sm:$0xff]  ;;  %v250_v34 = vmul.f32 %v3348_v30, %v243_v44 }
  0xcc   :  { %3351 = vrcp.f32 %v223_v23  ;;  %v268_v27 = vpack.c.bf16 %v3957_v26, %v3954_v25 }
  0xcd   :  { %2275 = vperm.xlu1 %3276, %v2911_v24   ;;  %v3977_v40 = vsel %vm236_vm5, %v3861_v59, %v250_v34  ;;  %v2633_v59 = vld [vmem:[%s4638_s8] sm:$0xff] }
  0xce   :  { %3048 = vmatprep.subr.bf16.mxu0 %v268_v27 }
  0xcf   :  { %3049 = vmatpush3.bf16.msra.mxu0 %v268_v27 }
  0xd1   :  { %2285 = vperm.xlu1 %3276, %v2913_v28  }
  0xd5   :  { %v3350_v32 = vpop.eup %3349  ;;  %2593 = vperm.xlu1 %3276, %v2938_v5  }
  0xd6   :  { %v3352_v37 = vpop.eup %3351  ;;  %v252_v38 = vmul.f32 %v3350_v32, %v245_v31 }
  0xd7   :  { %v251_v12 = vmul.f32 %v3352_v37, %v244_v33 }
  0xd8   :  { %v3983_v42 = vsel %vm238_vm7, %v3895_v36, %v252_v38 }
  0xd9   :  { %2603 = vperm.xlu1 %3276, %v2940_v14   ;;  %v3980_v41 = vsel %vm237_vm6, %v3900_v39, %v251_v12  ;;  %v270_v46 = vpack.c.bf16 %v3983_v42, %v3983_v42  ;;  %v3278_v39 = vld [vmem:[%s4633_s3 + $0x8] sm:$0xff]  }
  0xda   :  { %v269_v43 = vpack.c.bf16 %v3980_v41, %v3977_v40 }
  0xdb   :  { %v346_v36 = vsel %vm344_vm8, %v270_v46, 0 }
  0xdc   :  { %3050 = vmatprep.subr.bf16.mxu0 %v269_v43 }
  0xdd   :  { %2613 = vperm.xlu1 %3276, %v2942_v45   ;;  %3051 = vmatpush3.bf16.msra.mxu0 %v269_v43 }
  0xde   :  { %3250 = vmatprep.subr.msk.bf16.mxu0 %vm344_vm8, %v270_v46 }
  0xe1   :  { %2636 = vperm.xlu1 %3276, %v2633_v59   ;;  %3053 = vmatpush3.bf16.msra.mxu0 %v346_v36 }
  0xe4   :  { %3055 = vmatmul.mubr.msk.bf16.vlgmr.msra.gmra.mrb[0].mxu0 %vm331_vm0, %v3278_v39 }
  0xe5   :  { %3058 = vmatprep.mubr.msk.bf16.mxu0 %vm331_vm0, %v3279_v47 }
  0xec   :  { %3059 = vmatmul.mubr.msk.bf16.gmra.mrb[4].mxu0 %vm331_vm0, %v3280_v48 }
 0x1b7   :  { %v3056_v53 = vpop.f32.mrb[0].mxu0 }
 0x1b8   :  { %v4013_v55 = vadd.f32 %v3056_v53, %v291_v52  ;;  %v382_v56 = vpop.f32.mrb[1].mxu0 }
 0x1b9   :  { %v4015_v61 = vadd.f32 %v382_v56, %v281_v50  ;;  %v3057_v62 = vpop.f32.mrb[2].mxu0 }
 0x1ba   :  { %v414_v63 = vmin.f32 %v4013_v55, 20.0  ;;  %v4018_v29 = vadd.f32 %v3057_v62, %v296_v54  ;;  %v385_v35 = vpop.f32.mrb[3].mxu0  ;;  %vm463_vm9 = vcmp.gt.f32.partialorder %v4013_v55, 20.0 }
 0x1bb   :  { %v412_v0 = vmin.f32 %v4015_v61, 20.0  ;;  %v4021_v2 = vadd.f32 %v385_v35, %v286_v51  ;;  %vm461_vm11 = vcmp.gt.f32.partialorder %v4015_v61, 20.0 }
 0x1bc   :  { %v423_v3 = vmul.f32 1.442695, %v414_v63  ;;  %v415_v4 = vmin.f32 %v4018_v29, 20.0  ;;  %vm464_vm10 = vcmp.gt.f32.partialorder %v4018_v29, 20.0 }
 0x1bd   :  { %v419_v6 = vmul.f32 1.442695, %v412_v0  ;;  %v413_v7 = vmin.f32 %v4021_v2, 20.0  ;;  %vm462_vm12 = vcmp.gt.f32.partialorder %v4021_v2, 20.0 }
 0x1be   :  { %3353 = vpow2.f32 %v423_v3  ;;  %v425_v8 = vmul.f32 1.442695, %v415_v4 }
 0x1bf   :  { %3355 = vpow2.f32 %v419_v6  ;;  %v421_v10 = vmul.f32 1.442695, %v413_v7  ;;  %v3060_v11 = vpop.f32.mrb[4].mxu0 }
 0x1c0   :  { %3357 = vpow2.f32 %v425_v8  ;;  %v4025_v13 = vadd.f32 %v3060_v11, %v311_v9  ;;  %v398_v15 = vpop.f32.mrb[5].mxu0 }
 0x1c1   :  { %3359 = vpow2.f32 %v421_v10  ;;  %v4027_v16 = vadd.f32 %v398_v15, %v301_v60  ;;  %v3061_v17 = vpop.f32.mrb[6].mxu0 }
 0x1c2   :  { %v418_v19 = vmin.f32 %v4025_v13, 20.0  ;;  %v401_v20 = vpop.f32.mrb[7].mxu0  ;;  %vm467_vm13 = vcmp.gt.f32.partialorder %v4025_v13, 20.0 }
 0x1c3   :  { %v416_v21 = vmin.f32 %v4027_v16, 20.0  ;;  %v4031_v22 = vadd.f32 %v401_v20, %v306_v18  ;;  %vm465_vm14 = vcmp.gt.f32.partialorder %v4027_v16, 20.0 }
 0x1c4   :  { %v431_v23 = vmul.f32 1.442695, %v418_v19 }
 0x1c5   :  { %v427_v24 = vmul.f32 1.442695, %v416_v21  ;;  %v417_v27 = vmin.f32 %v4031_v22, 20.0  ;;  %vm466_vm15 = vcmp.gt.f32.partialorder %v4031_v22, 20.0 }
 0x1c6   :  { %3361 = vpow2.f32 %v431_v23 }
 0x1c7   :  { %3363 = vpow2.f32 %v427_v24  ;;  %v429_v28 = vmul.f32 1.442695, %v417_v27 }
 0x1c8   :  { %v3354_v30 = vpop.eup %3353 }
 0x1c9   :  { %v3356_v5 = vpop.eup %3355  ;;  %v435_v44 = vadd.f32 2.0, %v3354_v30  ;;  %3365 = vpow2.f32 %v429_v28 }
 0x1ca   :  { %v3358_v31 = vpop.eup %3357  ;;  %v433_v32 = vadd.f32 2.0, %v3356_v5 }
 0x1cb   :  { %v3360_v33 = vpop.eup %3359  ;;  %v442_v34 = vmul.f32 %v3354_v30, %v435_v44  ;;  %v436_v37 = vadd.f32 2.0, %v3358_v31 }
 0x1cc   :  { %v440_v14 = vmul.f32 %v3356_v5, %v433_v32  ;;  %v434_v38 = vadd.f32 2.0, %v3360_v33 }
 0x1cd   :  { %v449_v12 = vadd.f32 2.0, %v442_v34  ;;  %v443_v43 = vmul.f32 %v3358_v31, %v436_v37  ;;  %v470_v62 = vmul.f32 %v442_v34, %v4013_v55 }
 0x1ce   :  { %v447_v45 = vadd.f32 2.0, %v440_v14  ;;  %v441_v46 = vmul.f32 %v3360_v33, %v434_v38  ;;  %v468_v0 = vmul.f32 %v440_v14, %v4015_v61  ;;  %v3282_v14 = vld [vmem:[%s4635_s5 + $0x8] sm:$0xff]   ;;  %v614_v38 = vpop.permute.xlu0 %613 }
 0x1cf   :  { %3367 = vrcp.f32 %v449_v12  ;;  %v450_v59 = vadd.f32 2.0, %v443_v43  ;;  %v471_v4 = vmul.f32 %v443_v43, %v4018_v29  ;;  %v619_v12 = vpop.permute.xlu1 %618 }
 0x1d0   :  { %v3362_v36 = vpop.eup %3361  ;;  %3369 = vrcp.f32 %v447_v45  ;;  %v448_v39 = vadd.f32 2.0, %v441_v46  ;;  %v469_v8 = vmul.f32 %v441_v46, %v4021_v2 }
 0x1d1   :  { %v3364_v47 = vpop.eup %3363  ;;  %3371 = vrcp.f32 %v450_v59  ;;  %v439_v48 = vadd.f32 2.0, %v3362_v36 }
 0x1d2   :  { %3373 = vrcp.f32 %v448_v39  ;;  %v437_v49 = vadd.f32 2.0, %v3364_v47  ;;  %v624_v45 = vpop.permute.xlu0 %623 }
 0x1d3   :  { %v3366_v50 = vpop.eup %3365  ;;  %v446_v51 = vmul.f32 %v3362_v36, %v439_v48 }
 0x1d4   :  { %v444_v52 = vmul.f32 %v3364_v47, %v437_v49  ;;  %v438_v53 = vadd.f32 2.0, %v3366_v50 }
 0x1d5   :  { %v453_v54 = vadd.f32 2.0, %v446_v51  ;;  %v474_v27 = vmul.f32 %v446_v51, %v4025_v13 }
 0x1d6   :  { %v451_v56 = vadd.f32 2.0, %v444_v52  ;;  %v445_v60 = vmul.f32 %v3366_v50, %v438_v53  ;;  %v472_v28 = vmul.f32 %v444_v52, %v4027_v16  ;;  %v629_v50 = vpop.permute.xlu1 %628 }
 0x1d7   :  { %3375 = vrcp.f32 %v453_v54  ;;  %v634_v54 = vpop.permute.xlu0 %633 }
 0x1d8   :  { %3377 = vrcp.f32 %v451_v56  ;;  %v452_v63 = vadd.f32 2.0, %v445_v60  ;;  %v473_v44 = vmul.f32 %v445_v60, %v4031_v22 }
 0x1d9   :  { %v3368_v35 = vpop.eup %3367 }
 0x1da   :  { %v3370_v3 = vpop.eup %3369  ;;  %3379 = vrcp.f32 %v452_v63  ;;  %v477_v6 = vmul.f32 %v3368_v35, %v470_v62 }
 0x1db   :  { %v3372_v7 = vpop.eup %3371  ;;  %v475_v9 = vmul.f32 %v3370_v3, %v468_v0  ;;  %v644_v3 = vpop.permute.xlu0 %643 }
 0x1dc   :  { %v3374_v10 = vpop.eup %3373  ;;  %v478_v11 = vmul.f32 %v3372_v7, %v471_v4  ;;  %v484_v17 = vsel %vm463_vm9, %v4013_v55, %v477_v6  ;;  %v639_v4 = vpop.permute.xlu1 %638 }
 0x1dd   :  { %v476_v15 = vmul.f32 %v3374_v10, %v469_v8  ;;  %v482_v19 = vsel %vm461_vm11, %v4015_v61, %v475_v9  ;;  %v3286_v9 = vld [vmem:[%s4633_s3 + $0x24] sm:$0xff]   ;;  %v3287_v10 = vld [vmem:[%s4633_s3 + $0x2c] sm:$0xff]  }
 0x1de   :  { %v485_v18 = vsel %vm464_vm10, %v4018_v29, %v478_v11  ;;  %v3288_v11 = vld [vmem:[%s4633_s3 + $0x34] ss:$0 sps:$4 sm:$0x11]  }
 0x1df   :  { %v483_v20 = vsel %vm462_vm12, %v4021_v2, %v476_v15  ;;  %v497_v21 = vpack.c.bf16 %v485_v18, %v484_v17  ;;  %v3289_v15 = vld [vmem:[%s4635_s5 + $0x1c] sm:$0xff]   ;;  %v681_v18 = vpop.permute.xlu0 %680 }
 0x1e0   :  { %v496_v23 = vpack.c.bf16 %v483_v20, %v482_v19  ;;  %v676_v17 = vpop.permute.xlu1 %675 }
 0x1e1   :  { %v3376_v24 = vpop.eup %3375 }
 0x1e2   :  { %v3378_v30 = vpop.eup %3377  ;;  %3062 = vmatprep.subr.bf16.mxu1 %v496_v23  ;;  %v481_v5 = vmul.f32 %v3376_v24, %v474_v27 }
 0x1e3   :  { %3063 = vmatpush3.bf16.msra.mxu1 %v496_v23  ;;  %v479_v55 = vmul.f32 %v3378_v30, %v472_v28 }
 0x1e4   :  { %v3380_v31 = vpop.eup %3379  ;;  %3064 = vmatprep.subr.bf16.mxu1 %v497_v21  ;;  %v488_v32 = vsel %vm467_vm13, %v4025_v13, %v481_v5  ;;  %v3284_v13 = vld [vmem:[%s4635_s5 + $0x18] ss:$0 sps:$4 sm:$0x11]   ;;  %v686_v19 = vpop.permute.xlu1 %685 }
 0x1e5   :  { %v480_v29 = vmul.f32 %v3380_v31, %v473_v44  ;;  %v486_v61 = vsel %vm465_vm14, %v4027_v16, %v479_v55  ;;  %v499_v34 = vpack.c.bf16 %v488_v32, %v488_v32  ;;  %v3283_v16 = vld [vmem:[%s4635_s5 + $0x10] sm:$0xff]  }
 0x1e7   :  { %3065 = vmatpush3.bf16.msra.mxu1 %v497_v21  ;;  %v487_v2 = vsel %vm466_vm15, %v4031_v22, %v480_v29  ;;  %v531_v37 = vsel %vm344_vm8, %v499_v34, 0  ;;  %v3285_v22 = vld [vmem:[%s4633_s3 + $0x1c] sm:$0xff]   ;;  %v691_v21 = vpop.permute.xlu0 %690 }
 0x1e8   :  { %v498_v33 = vpack.c.bf16 %v487_v2, %v486_v61  ;;  %3086 = vmatprep.mubr.msk.bf16.mxu0 %vm331_vm0, %v3285_v22  ;;  %v696_v27 = vpop.permute.xlu1 %695 }
 0x1ea   :  { %3066 = vmatprep.subr.bf16.mxu1 %v498_v33 }
 0x1eb   :  { %3067 = vmatpush3.bf16.msra.mxu1 %v498_v33 }
 0x1ec   :  { %3251 = vmatprep.subr.msk.bf16.mxu1 %vm344_vm8, %v499_v34 }
 0x1ef   :  { %3069 = vmatpush3.bf16.msra.mxu1 %v531_v37  ;;  %v706_v37 = vpop.permute.xlu1 %705 }
 0x1f2   :  { %3071 = vmatmul.mubr.msk.bf16.vlgmr.msra.gmra.mrb[0].mxu1 %vm331_vm0, %v3282_v14 }
 0x1f3   :  { %3074 = vmatprep.mubr.msk.bf16.mxu1 %vm331_vm0, %v3283_v16 }
 0x1fa   :  { %3075 = vmatmul.mubr.msk.bf16.gmra.mrb[4].mxu1 %vm331_vm0, %v3284_v13 }
 0x1fb   :  { %3102 = vmatprep.mubr.msk.bf16.mxu1 %vm331_vm0, %v3289_v15 }
 0x2c5   :  { %v3072_v43 = vpop.f32.mrb[0].mxu1 }
 0x2c6   :  { %v567_v46 = vpop.f32.mrb[1].mxu1  ;;  %v599_v48 = vadd.f32 %v3072_v43, %v3954_v25  ;;  %v701_v43 = vpop.permute.xlu0 %700 }
 0x2c7   :  { %v597_v59 = vadd.f32 %v567_v46, %v3918_v57  ;;  %v3073_v36 = vpop.f32.mrb[2].mxu1 }
 0x2c8   :  { %v600_v39 = vadd.f32 %v3073_v36, %v3957_v26  ;;  %v570_v47 = vpop.f32.mrb[3].mxu1  ;;  %v4083_v56 = vadd.f32 %v624_v45, %v599_v48 }
 0x2c9   :  { %v598_v49 = vadd.f32 %v570_v47, %v3921_v58  ;;  %v4077_v51 = vadd.f32 %v614_v38, %v597_v59 }
 0x2ca   :  { %v4079_v52 = vadd.f32 %v629_v50, %v600_v39 }
 0x2cb   :  { %v4081_v53 = vadd.f32 %v619_v12, %v598_v49 }
 0x2cc   :  { %v662_v63 = vpack.c.bf16 %v4079_v52, %v4083_v56 }
 0x2cd   :  { %v3076_v60 = vpop.f32.mrb[4].mxu1  ;;  %v661_v57 = vpack.c.bf16 %v4081_v53, %v4077_v51 }
 0x2ce   :  { %v583_v26 = vpop.f32.mrb[5].mxu1  ;;  %v603_v62 = vadd.f32 %v3076_v60, %v3983_v42 }
 0x2cf   :  { %v601_v25 = vadd.f32 %v583_v26, %v3977_v40  ;;  %v3077_v58 = vpop.f32.mrb[6].mxu1  ;;  %3078 = vmatprep.subr.bf16.mxu0 %v661_v57 }
 0x2d0   :  { %v586_v35 = vpop.f32.mrb[7].mxu1  ;;  %3079 = vmatpush3.bf16.msra.mxu0 %v661_v57  ;;  %v4092_v6 = vadd.f32 %v644_v3, %v603_v62 }
 0x2d1   :  { %v602_v0 = vadd.f32 %v586_v35, %v3980_v41  ;;  %3080 = vmatprep.subr.bf16.mxu0 %v662_v63  ;;  %v4094_v7 = vadd.f32 %v634_v54, %v601_v25 }
 0x2d2   :  { %v664_v42 = vpack.c.bf16 %v4092_v6, %v4092_v6 }
 0x2d3   :  { %v4096_v8 = vadd.f32 %v639_v4, %v602_v0 }
 0x2d4   :  { %3081 = vmatpush3.bf16.msra.mxu0 %v662_v63  ;;  %v739_v41 = vsel %vm344_vm8, %v664_v42, 0 }
 0x2d5   :  { %v663_v40 = vpack.c.bf16 %v4096_v8, %v4094_v7 }
 0x2d7   :  { %3082 = vmatprep.subr.bf16.mxu0 %v663_v40 }
 0x2d8   :  { %3083 = vmatpush3.bf16.msra.mxu0 %v663_v40 }
 0x2d9   :  { %3252 = vmatprep.subr.msk.bf16.mxu0 %vm344_vm8, %v664_v42 }
 0x2dc   :  { %3085 = vmatpush3.bf16.msra.mxu0 %v739_v41 }
 0x2df   :  { %3087 = vmatmul.mubr.msk.bf16.vlgmr.msra.gmra.mrb[8].mxu0 %vm331_vm0, %v3286_v9 }
 0x2e0   :  { %3090 = vmatprep.mubr.msk.bf16.mxu0 %vm331_vm0, %v3287_v10 }
 0x2e7   :  { %3091 = vmatmul.mubr.msk.bf16.gmra.mrb[12].mxu0 %vm331_vm0, %v3288_v11 }
 0x3b2   :  { %v3088_v20 = vpop.f32.mrb[8].mxu0 }
 0x3b3   :  { %v4120_v23 = vadd.f32 %v3088_v20, %v686_v19  ;;  %v775_v24 = vpop.f32.mrb[9].mxu0 }
 0x3b4   :  { %v4122_v28 = vadd.f32 %v775_v24, %v676_v17  ;;  %v3089_v30 = vpop.f32.mrb[10].mxu0 }
 0x3b5   :  { %v807_v5 = vmin.f32 %v4120_v23, 20.0  ;;  %v4125_v44 = vadd.f32 %v3089_v30, %v691_v21  ;;  %v778_v55 = vpop.f32.mrb[11].mxu0  ;;  %vm856_vm1 = vcmp.gt.f32.partialorder %v4120_v23, 20.0 }
 0x3b6   :  { %v805_v31 = vmin.f32 %v4122_v28, 20.0  ;;  %v4128_v29 = vadd.f32 %v778_v55, %v681_v18  ;;  %vm854_vm3 = vcmp.gt.f32.partialorder %v4122_v28, 20.0 }
 0x3b7   :  { %v816_v61 = vmul.f32 1.442695, %v807_v5  ;;  %v808_v2 = vmin.f32 %v4125_v44, 20.0  ;;  %vm857_vm2 = vcmp.gt.f32.partialorder %v4125_v44, 20.0 }
 0x3b8   :  { %v812_v32 = vmul.f32 1.442695, %v805_v31  ;;  %v806_v33 = vmin.f32 %v4128_v29, 20.0  ;;  %vm855_vm4 = vcmp.gt.f32.partialorder %v4128_v29, 20.0 }
 0x3b9   :  { %3381 = vpow2.f32 %v816_v61  ;;  %v818_v34 = vmul.f32 1.442695, %v808_v2 }
 0x3ba   :  { %3383 = vpow2.f32 %v812_v32  ;;  %v814_v14 = vmul.f32 1.442695, %v806_v33  ;;  %v3092_v16 = vpop.f32.mrb[12].mxu0 }
 0x3bb   :  { %3385 = vpow2.f32 %v818_v34  ;;  %v4132_v13 = vadd.f32 %v3092_v16, %v706_v37  ;;  %v791_v22 = vpop.f32.mrb[13].mxu0 }
 0x3bc   :  { %3387 = vpow2.f32 %v814_v14  ;;  %v4134_v38 = vadd.f32 %v791_v22, %v696_v27  ;;  %v3093_v12 = vpop.f32.mrb[14].mxu0 }
 0x3bd   :  { %v811_v45 = vmin.f32 %v4132_v13, 20.0  ;;  %v794_v46 = vpop.f32.mrb[15].mxu0  ;;  %vm860_vm5 = vcmp.gt.f32.partialorder %v4132_v13, 20.0 }
 0x3be   :  { %v809_v59 = vmin.f32 %v4134_v38, 20.0  ;;  %v4138_v36 = vadd.f32 %v794_v46, %v701_v43  ;;  %vm858_vm6 = vcmp.gt.f32.partialorder %v4134_v38, 20.0 }
 0x3bf   :  { %v824_v39 = vmul.f32 1.442695, %v811_v45 }
 0x3c0   :  { %v820_v47 = vmul.f32 1.442695, %v809_v59  ;;  %v810_v48 = vmin.f32 %v4138_v36, 20.0  ;;  %vm859_vm7 = vcmp.gt.f32.partialorder %v4138_v36, 20.0 }
 0x3c1   :  { %3389 = vpow2.f32 %v824_v39 }
 0x3c2   :  { %3391 = vpow2.f32 %v820_v47  ;;  %v822_v49 = vmul.f32 1.442695, %v810_v48 }
 0x3c3   :  { %v3382_v50 = vpop.eup %3381 }
 0x3c4   :  { %v3384_v54 = vpop.eup %3383  ;;  %v828_v60 = vadd.f32 2.0, %v3382_v50  ;;  %3393 = vpow2.f32 %v822_v49 }
 0x3c5   :  { %v3386_v57 = vpop.eup %3385  ;;  %v826_v26 = vadd.f32 2.0, %v3384_v54 }
 0x3c6   :  { %v3388_v62 = vpop.eup %3387  ;;  %v835_v25 = vmul.f32 %v3382_v50, %v828_v60  ;;  %v829_v58 = vadd.f32 2.0, %v3386_v57 }
 0x3c7   :  { %v833_v63 = vmul.f32 %v3384_v54, %v826_v26  ;;  %v827_v35 = vadd.f32 2.0, %v3388_v62 }
 0x3c8   :  { %v842_v0 = vadd.f32 2.0, %v835_v25  ;;  %v836_v3 = vmul.f32 %v3386_v57, %v829_v58  ;;  %v863_v30 = vmul.f32 %v835_v25, %v4120_v23 }
 0x3c9   :  { %v840_v4 = vadd.f32 2.0, %v833_v63  ;;  %v834_v40 = vmul.f32 %v3388_v62, %v827_v35  ;;  %v861_v31 = vmul.f32 %v833_v63, %v4122_v28  ;;  %v3290_v63 = vld [vmem:[%s4635_s5 + $0x24] sm:$0xff]   ;;  %v1009_v35 = vpop.permute.xlu0 %1008 }
 0x3ca   :  { %3395 = vrcp.f32 %v842_v0  ;;  %v843_v42 = vadd.f32 2.0, %v836_v3  ;;  %v864_v2 = vmul.f32 %v836_v3, %v4125_v44  ;;  %v1014_v0 = vpop.permute.xlu1 %1013 }
 0x3cb   :  { %v3390_v41 = vpop.eup %3389  ;;  %3397 = vrcp.f32 %v840_v4  ;;  %v841_v9 = vadd.f32 2.0, %v834_v40  ;;  %v862_v34 = vmul.f32 %v834_v40, %v4128_v29 }
 0x3cc   :  { %v3392_v10 = vpop.eup %3391  ;;  %3399 = vrcp.f32 %v843_v42  ;;  %v832_v11 = vadd.f32 2.0, %v3390_v41 }
 0x3cd   :  { %3401 = vrcp.f32 %v841_v9  ;;  %v830_v15 = vadd.f32 2.0, %v3392_v10  ;;  %v1019_v4 = vpop.permute.xlu0 %1018 }
 0x3ce   :  { %v3394_v17 = vpop.eup %3393  ;;  %v839_v18 = vmul.f32 %v3390_v41, %v832_v11 }
 0x3cf   :  { %v837_v19 = vmul.f32 %v3392_v10, %v830_v15  ;;  %v831_v20 = vadd.f32 2.0, %v3394_v17 }
 0x3d0   :  { %v846_v21 = vadd.f32 2.0, %v839_v18  ;;  %v867_v48 = vmul.f32 %v839_v18, %v4132_v13 }
 0x3d1   :  { %v844_v24 = vadd.f32 2.0, %v837_v19  ;;  %v838_v27 = vmul.f32 %v3394_v17, %v831_v20  ;;  %v865_v49 = vmul.f32 %v837_v19, %v4134_v38  ;;  %v1024_v17 = vpop.permute.xlu1 %1023 }
 0x3d2   :  { %3403 = vrcp.f32 %v846_v21  ;;  %v1029_v21 = vpop.permute.xlu0 %1028 }
 0x3d3   :  { %3405 = vrcp.f32 %v844_v24  ;;  %v845_v5 = vadd.f32 2.0, %v838_v27  ;;  %v866_v60 = vmul.f32 %v838_v27, %v4138_v36 }
 0x3d4   :  { %v3396_v55 = vpop.eup %3395 }
 0x3d5   :  { %v3398_v61 = vpop.eup %3397  ;;  %3407 = vrcp.f32 %v845_v5  ;;  %v870_v32 = vmul.f32 %v3396_v55, %v863_v30 }
 0x3d6   :  { %v3400_v33 = vpop.eup %3399  ;;  %v868_v37 = vmul.f32 %v3398_v61, %v861_v31  ;;  %v1039_v61 = vpop.permute.xlu0 %1038 }
 0x3d7   :  { %v3402_v14 = vpop.eup %3401  ;;  %v871_v16 = vmul.f32 %v3400_v33, %v864_v2  ;;  %v877_v12 = vsel %vm856_vm1, %v4120_v23, %v870_v32  ;;  %v1034_v2 = vpop.permute.xlu1 %1033 }
 0x3d8   :  { %v869_v22 = vmul.f32 %v3402_v14, %v862_v34  ;;  %v875_v45 = vsel %vm854_vm3, %v4122_v28, %v868_v37  ;;  %v3294_v37 = vld [vmem:[%s4633_s3 + $0x40] sm:$0xff]   ;;  %v3295_v14 = vld [vmem:[%s4633_s3 + $0x48] sm:$0xff]  }
 0x3d9   :  { %v878_v43 = vsel %vm857_vm2, %v4125_v44, %v871_v16  ;;  %v3296_v16 = vld [vmem:[%s4633_s3 + $0x50] ss:$0 sps:$4 sm:$0x11]  }
 0x3da   :  { %v876_v46 = vsel %vm855_vm4, %v4128_v29, %v869_v22  ;;  %v891_v59 = vpack.c.bf16 %v878_v43, %v877_v12  ;;  %v3297_v22 = vld [vmem:[%s4635_s5 + $0x38] sm:$0xff]   ;;  %v1076_v43 = vpop.permute.xlu0 %1075 }
 0x3db   :  { %v890_v39 = vpack.c.bf16 %v876_v46, %v875_v45  ;;  %v1071_v12 = vpop.permute.xlu1 %1070 }
 0x3dc   :  { %v3404_v47 = vpop.eup %3403 }
 0x3dd   :  { %v3406_v50 = vpop.eup %3405  ;;  %3094 = vmatprep.subr.bf16.mxu1 %v890_v39  ;;  %v874_v54 = vmul.f32 %v3404_v47, %v867_v48 }
 0x3de   :  { %3095 = vmatpush3.bf16.msra.mxu1 %v890_v39  ;;  %v872_v23 = vmul.f32 %v3406_v50, %v865_v49 }
 0x3df   :  { %v3408_v57 = vpop.eup %3407  ;;  %3096 = vmatprep.subr.bf16.mxu1 %v891_v59  ;;  %v881_v26 = vsel %vm860_vm5, %v4132_v13, %v874_v54  ;;  %v3292_v13 = vld [vmem:[%s4635_s5 + $0x34] ss:$0 sps:$4 sm:$0x11]   ;;  %v1081_v45 = vpop.permute.xlu1 %1080 }
 0x3e0   :  { %v873_v44 = vmul.f32 %v3408_v57, %v866_v60  ;;  %v879_v28 = vsel %vm858_vm6, %v4134_v38, %v872_v23  ;;  %v893_v25 = vpack.c.bf16 %v881_v26, %v881_v26  ;;  %v3291_v38 = vld [vmem:[%s4635_s5 + $0x2c] sm:$0xff]  }
 0x3e2   :  { %3097 = vmatpush3.bf16.msra.mxu1 %v891_v59  ;;  %v880_v29 = vsel %vm859_vm7, %v4138_v36, %v873_v44  ;;  %v925_v58 = vsel %vm344_vm8, %v893_v25, 0  ;;  %v3293_v36 = vld [vmem:[%s4633_s3 + $0x38] sm:$0xff]   ;;  %v1086_v59 = vpop.permute.xlu0 %1085 }
 0x3e3   :  { %v892_v62 = vpack.c.bf16 %v880_v29, %v879_v28  ;;  %3118 = vmatprep.mubr.msk.bf16.mxu0 %vm331_vm0, %v3293_v36  ;;  %v1091_v48 = vpop.permute.xlu1 %1090 }
 0x3e5   :  { %3098 = vmatprep.subr.bf16.mxu1 %v892_v62 }
 0x3e6   :  { %3099 = vmatpush3.bf16.msra.mxu1 %v892_v62 }
 0x3e7   :  { %3253 = vmatprep.subr.msk.bf16.mxu1 %vm344_vm8, %v893_v25 }
 0x3ea   :  { %3101 = vmatpush3.bf16.msra.mxu1 %v925_v58  ;;  %v1101_v58 = vpop.permute.xlu1 %1100 }
 0x3ed   :  { %3103 = vmatmul.mubr.msk.bf16.vlgmr.msra.gmra.mrb[8].mxu1 %vm331_vm0, %v3290_v63 }
 0x3ee   :  { %3106 = vmatprep.mubr.msk.bf16.mxu1 %vm331_vm0, %v3291_v38 }
 0x3f5   :  { %3107 = vmatmul.mubr.msk.bf16.gmra.mrb[12].mxu1 %vm331_vm0, %v3292_v13 }
 0x3f6   :  { %3134 = vmatprep.mubr.msk.bf16.mxu1 %vm331_vm0, %v3297_v22 }
 0x4c0   :  { %v3104_v3 = vpop.f32.mrb[8].mxu1 }
 0x4c1   :  { %v961_v40 = vpop.f32.mrb[9].mxu1  ;;  %v993_v11 = vadd.f32 %v3104_v3, %v4083_v56  ;;  %v1096_v3 = vpop.permute.xlu0 %1095 }
 0x4c2   :  { %v991_v42 = vadd.f32 %v961_v40, %v4077_v51  ;;  %v3105_v41 = vpop.f32.mrb[10].mxu1 }
 0x4c3   :  { %v994_v9 = vadd.f32 %v3105_v41, %v4079_v52  ;;  %v964_v10 = vpop.f32.mrb[11].mxu1  ;;  %v4190_v24 = vadd.f32 %v1019_v4, %v993_v11 }
 0x4c4   :  { %v992_v15 = vadd.f32 %v964_v10, %v4081_v53  ;;  %v4184_v18 = vadd.f32 %v1009_v35, %v991_v42 }
 0x4c5   :  { %v4186_v19 = vadd.f32 %v1024_v17, %v994_v9 }
 0x4c6   :  { %v4188_v20 = vadd.f32 %v1014_v0, %v992_v15 }
 0x4c7   :  { %v1057_v5 = vpack.c.bf16 %v4186_v19, %v4190_v24 }
 0x4c8   :  { %v3108_v27 = vpop.f32.mrb[12].mxu1  ;;  %v1056_v51 = vpack.c.bf16 %v4188_v20, %v4184_v18 }
 0x4c9   :  { %v977_v52 = vpop.f32.mrb[13].mxu1  ;;  %v997_v30 = vadd.f32 %v3108_v27, %v4092_v6 }
 0x4ca   :  { %v995_v56 = vadd.f32 %v977_v52, %v4094_v7  ;;  %v3109_v53 = vpop.f32.mrb[14].mxu1  ;;  %3110 = vmatprep.subr.bf16.mxu0 %v1056_v51 }
 0x4cb   :  { %v980_v55 = vpop.f32.mrb[15].mxu1  ;;  %3111 = vmatpush3.bf16.msra.mxu0 %v1056_v51  ;;  %v4199_v32 = vadd.f32 %v1039_v61, %v997_v30 }
 0x4cc   :  { %v996_v31 = vadd.f32 %v980_v55, %v4096_v8  ;;  %3112 = vmatprep.subr.bf16.mxu0 %v1057_v5  ;;  %v4201_v33 = vadd.f32 %v1029_v21, %v995_v56 }
 0x4cd   :  { %v1059_v7 = vpack.c.bf16 %v4199_v32, %v4199_v32 }
 0x4ce   :  { %v4203_v34 = vadd.f32 %v1034_v2, %v996_v31 }
 0x4cf   :  { %3113 = vmatpush3.bf16.msra.mxu0 %v1057_v5  ;;  %v1134_v8 = vsel %vm344_vm8, %v1059_v7, 0 }
 0x4d0   :  { %v1058_v6 = vpack.c.bf16 %v4203_v34, %v4201_v33 }
 0x4d2   :  { %3114 = vmatprep.subr.bf16.mxu0 %v1058_v6 }
 0x4d3   :  { %3115 = vmatpush3.bf16.msra.mxu0 %v1058_v6 }
 0x4d4   :  { %3254 = vmatprep.subr.msk.bf16.mxu0 %vm344_vm8, %v1059_v7 }
 0x4d7   :  { %3117 = vmatpush3.bf16.msra.mxu0 %v1134_v8 }
 0x4da   :  { %3119 = vmatmul.mubr.msk.bf16.vlgmr.msra.gmra.mrb[16].mxu0 %vm331_vm0, %v3294_v37 }
 0x4db   :  { %3122 = vmatprep.mubr.msk.bf16.mxu0 %vm331_vm0, %v3295_v14 }
 0x4e2   :  { %3123 = vmatmul.mubr.msk.bf16.gmra.mrb[20].mxu0 %vm331_vm0, %v3296_v16 }
 0x5ad   :  { %v3120_v46 = vpop.f32.mrb[16].mxu0 }
 0x5ae   :  { %v4227_v39 = vadd.f32 %v3120_v46, %v1081_v45  ;;  %v1170_v47 = vpop.f32.mrb[17].mxu0 }
 0x5af   :  { %v4229_v49 = vadd.f32 %v1170_v47, %v1071_v12  ;;  %v3121_v50 = vpop.f32.mrb[18].mxu0 }
 0x5b0   :  { %v1202_v54 = vmin.f32 %v4227_v39, 20.0  ;;  %v4232_v60 = vadd.f32 %v3121_v50, %v1086_v59  ;;  %v1173_v23 = vpop.f32.mrb[19].mxu0  ;;  %vm1251_vm9 = vcmp.gt.f32.partialorder %v4227_v39, 20.0 }
 0x5b1   :  { %v1200_v57 = vmin.f32 %v4229_v49, 20.0  ;;  %v4235_v44 = vadd.f32 %v1173_v23, %v1076_v43  ;;  %vm1249_vm11 = vcmp.gt.f32.partialorder %v4229_v49, 20.0 }
 0x5b2   :  { %v1211_v28 = vmul.f32 1.442695, %v1202_v54  ;;  %v1203_v29 = vmin.f32 %v4232_v60, 20.0  ;;  %vm1252_vm10 = vcmp.gt.f32.partialorder %v4232_v60, 20.0 }
 0x5b3   :  { %v1207_v26 = vmul.f32 1.442695, %v1200_v57  ;;  %v1201_v62 = vmin.f32 %v4235_v44, 20.0  ;;  %vm1250_vm12 = vcmp.gt.f32.partialorder %v4235_v44, 20.0 }
 0x5b4   :  { %3409 = vpow2.f32 %v1211_v28  ;;  %v1213_v25 = vmul.f32 1.442695, %v1203_v29 }
 0x5b5   :  { %3411 = vpow2.f32 %v1207_v26  ;;  %v1209_v63 = vmul.f32 1.442695, %v1201_v62  ;;  %v3124_v38 = vpop.f32.mrb[20].mxu0 }
 0x5b6   :  { %3413 = vpow2.f32 %v1213_v25  ;;  %v4239_v13 = vadd.f32 %v3124_v38, %v1101_v58  ;;  %v1186_v36 = vpop.f32.mrb[21].mxu0 }
 0x5b7   :  { %3415 = vpow2.f32 %v1209_v63  ;;  %v4241_v35 = vadd.f32 %v1186_v36, %v1091_v48  ;;  %v3125_v0 = vpop.f32.mrb[22].mxu0 }
 0x5b8   :  { %v1206_v4 = vmin.f32 %v4239_v13, 20.0  ;;  %v1189_v40 = vpop.f32.mrb[23].mxu0  ;;  %vm1255_vm13 = vcmp.gt.f32.partialorder %v4239_v13, 20.0 }
 0x5b9   :  { %v1204_v42 = vmin.f32 %v4241_v35, 20.0  ;;  %v4245_v41 = vadd.f32 %v1189_v40, %v1096_v3  ;;  %vm1253_vm14 = vcmp.gt.f32.partialorder %v4241_v35, 20.0 }
 0x5ba   :  { %v1219_v9 = vmul.f32 1.442695, %v1206_v4 }
 0x5bb   :  { %v1215_v10 = vmul.f32 1.442695, %v1204_v42  ;;  %v1205_v11 = vmin.f32 %v4245_v41, 20.0  ;;  %vm1254_vm15 = vcmp.gt.f32.partialorder %v4245_v41, 20.0 }
 0x5bc   :  { %3417 = vpow2.f32 %v1219_v9 }
 0x5bd   :  { %3419 = vpow2.f32 %v1215_v10  ;;  %v1217_v15 = vmul.f32 1.442695, %v1205_v11 }
 0x5be   :  { %v3410_v17 = vpop.eup %3409 }
 0x5bf   :  { %v3412_v21 = vpop.eup %3411  ;;  %v1223_v27 = vadd.f32 2.0, %v3410_v17  ;;  %3421 = vpow2.f32 %v1217_v15 }
 0x5c0   :  { %v3414_v51 = vpop.eup %3413  ;;  %v1221_v52 = vadd.f32 2.0, %v3412_v21 }
 0x5c1   :  { %v3416_v30 = vpop.eup %3415  ;;  %v1230_v56 = vmul.f32 %v3410_v17, %v1223_v27  ;;  %v1224_v53 = vadd.f32 2.0, %v3414_v51 }
 0x5c2   :  { %v1228_v5 = vmul.f32 %v3412_v21, %v1221_v52  ;;  %v1222_v55 = vadd.f32 2.0, %v3416_v30 }
 0x5c3   :  { %v1237_v31 = vadd.f32 2.0, %v1230_v56  ;;  %v1231_v61 = vmul.f32 %v3414_v51, %v1224_v53  ;;  %v1258_v50 = vmul.f32 %v1230_v56, %v4227_v39 }
 0x5c4   :  { %v1235_v2 = vadd.f32 2.0, %v1228_v5  ;;  %v1229_v6 = vmul.f32 %v3416_v30, %v1222_v55  ;;  %v1256_v57 = vmul.f32 %v1228_v5, %v4229_v49  ;;  %v3298_v5 = vld [vmem:[%s4635_s5 + $0x40] sm:$0xff]   ;;  %v1404_v55 = vpop.permute.xlu0 %1403 }
 0x5c5   :  { %3423 = vrcp.f32 %v1237_v31  ;;  %v1238_v7 = vadd.f32 2.0, %v1231_v61  ;;  %v1259_v29 = vmul.f32 %v1231_v61, %v4232_v60  ;;  %v1409_v31 = vpop.permute.xlu1 %1408 }
 0x5c6   :  { %v3418_v8 = vpop.eup %3417  ;;  %3425 = vrcp.f32 %v1235_v2  ;;  %v1236_v37 = vadd.f32 2.0, %v1229_v6  ;;  %v1257_v25 = vmul.f32 %v1229_v6, %v4235_v44 }
 0x5c7   :  { %v3420_v14 = vpop.eup %3419  ;;  %3427 = vrcp.f32 %v1238_v7  ;;  %v1227_v16 = vadd.f32 2.0, %v3418_v8 }
 0x5c8   :  { %3429 = vrcp.f32 %v1236_v37  ;;  %v1225_v22 = vadd.f32 2.0, %v3420_v14  ;;  %v1414_v2 = vpop.permute.xlu0 %1413 }
 0x5c9   :  { %v3422_v12 = vpop.eup %3421  ;;  %v1234_v43 = vmul.f32 %v3418_v8, %v1227_v16 }
 0x5ca   :  { %v1232_v45 = vmul.f32 %v3420_v14, %v1225_v22  ;;  %v1226_v46 = vadd.f32 2.0, %v3422_v12 }
 0x5cb   :  { %v1241_v59 = vadd.f32 2.0, %v1234_v43  ;;  %v1262_v11 = vmul.f32 %v1234_v43, %v4239_v13 }
 0x5cc   :  { %v1239_v47 = vadd.f32 2.0, %v1232_v45  ;;  %v1233_v48 = vmul.f32 %v3422_v12, %v1226_v46  ;;  %v1260_v15 = vmul.f32 %v1232_v45, %v4241_v35  ;;  %v1419_v12 = vpop.permute.xlu1 %1418 }
 0x5cd   :  { %3431 = vrcp.f32 %v1241_v59  ;;  %v1424_v59 = vpop.permute.xlu0 %1423 }
 0x5ce   :  { %3433 = vrcp.f32 %v1239_v47  ;;  %v1240_v54 = vadd.f32 2.0, %v1233_v48  ;;  %v1261_v27 = vmul.f32 %v1233_v48, %v4245_v41 }
 0x5cf   :  { %v3424_v23 = vpop.eup %3423 }
 0x5d0   :  { %v3426_v28 = vpop.eup %3425  ;;  %3435 = vrcp.f32 %v1240_v54  ;;  %v1265_v26 = vmul.f32 %v3424_v23, %v1258_v50 }
 0x5d1   :  { %v3428_v62 = vpop.eup %3427  ;;  %v1263_v58 = vmul.f32 %v3426_v28, %v1256_v57  ;;  %v1434_v28 = vpop.permute.xlu0 %1433 }
 0x5d2   :  { %v3430_v63 = vpop.eup %3429  ;;  %v1266_v38 = vmul.f32 %v3428_v62, %v1259_v29  ;;  %v1272_v0 = vsel %vm1251_vm9, %v4227_v39, %v1265_v26  ;;  %v1429_v29 = vpop.permute.xlu1 %1428 }
 0x5d3   :  { %v1264_v36 = vmul.f32 %v3430_v63, %v1257_v25  ;;  %v1270_v4 = vsel %vm1249_vm11, %v4229_v49, %v1263_v58  ;;  %v3302_v58 = vld [vmem:[%s4633_s3 + $0x5c] sm:$0xff]   ;;  %v3303_v63 = vld [vmem:[%s4633_s3 + $0x64] sm:$0xff]  }
 0x5d4   :  { %v1273_v3 = vsel %vm1252_vm10, %v4232_v60, %v1266_v38  ;;  %v3304_v38 = vld [vmem:[%s4633_s3 + $0x6c] ss:$0 sps:$4 sm:$0x11]  }
 0x5d5   :  { %v1271_v40 = vsel %vm1250_vm12, %v4235_v44, %v1264_v36  ;;  %v1286_v42 = vpack.c.bf16 %v1273_v3, %v1272_v0  ;;  %v3305_v36 = vld [vmem:[%s4635_s5 + $0x54] sm:$0xff]   ;;  %v1471_v3 = vpop.permute.xlu0 %1470 }
 0x5d6   :  { %v1285_v9 = vpack.c.bf16 %v1271_v40, %v1270_v4  ;;  %v1466_v0 = vpop.permute.xlu1 %1465 }
 0x5d7   :  { %v3432_v10 = vpop.eup %3431 }
 0x5d8   :  { %v3434_v17 = vpop.eup %3433  ;;  %3126 = vmatprep.subr.bf16.mxu1 %v1285_v9  ;;  %v1269_v21 = vmul.f32 %v3432_v10, %v1262_v11 }
 0x5d9   :  { %3127 = vmatpush3.bf16.msra.mxu1 %v1285_v9  ;;  %v1267_v39 = vmul.f32 %v3434_v17, %v1260_v15 }
 0x5da   :  { %v3436_v51 = vpop.eup %3435  ;;  %3128 = vmatprep.subr.bf16.mxu1 %v1286_v42  ;;  %v1276_v52 = vsel %vm1255_vm13, %v4239_v13, %v1269_v21  ;;  %v3300_v13 = vld [vmem:[%s4635_s5 + $0x50] ss:$0 sps:$4 sm:$0x11]   ;;  %v1476_v4 = vpop.permute.xlu1 %1475 }
 0x5db   :  { %v1268_v60 = vmul.f32 %v3436_v51, %v1261_v27  ;;  %v1274_v49 = vsel %vm1253_vm14, %v4241_v35, %v1267_v39  ;;  %v1288_v56 = vpack.c.bf16 %v1276_v52, %v1276_v52  ;;  %v3299_v35 = vld [vmem:[%s4635_s5 + $0x48] sm:$0xff]  }
 0x5dd   :  { %3129 = vmatpush3.bf16.msra.mxu1 %v1286_v42  ;;  %v1275_v44 = vsel %vm1254_vm15, %v4245_v41, %v1268_v60  ;;  %v1320_v53 = vsel %vm344_vm8, %v1288_v56, 0  ;;  %v3301_v41 = vld [vmem:[%s4633_s3 + $0x54] sm:$0xff]   ;;  %v1481_v42 = vpop.permute.xlu0 %1480 }
 0x5de   :  { %v1287_v30 = vpack.c.bf16 %v1275_v44, %v1274_v49  ;;  %3150 = vmatprep.mubr.msk.bf16.mxu0 %vm331_vm0, %v3301_v41  ;;  %v1486_v11 = vpop.permute.xlu1 %1485 }
 0x5e0   :  { %3130 = vmatprep.subr.bf16.mxu1 %v1287_v30 }
 0x5e1   :  { %3131 = vmatpush3.bf16.msra.mxu1 %v1287_v30 }
 0x5e2   :  { %3255 = vmatprep.subr.msk.bf16.mxu1 %vm344_vm8, %v1288_v56 }
 0x5e5   :  { %3133 = vmatpush3.bf16.msra.mxu1 %v1320_v53  ;;  %v1496_v53 = vpop.permute.xlu1 %1495 }
 0x5e8   :  { %3135 = vmatmul.mubr.msk.bf16.vlgmr.msra.gmra.mrb[16].mxu1 %vm331_vm0, %v3298_v5 }
 0x5e9   :  { %3138 = vmatprep.mubr.msk.bf16.mxu1 %vm331_vm0, %v3299_v35 }
 0x5f0   :  { %3139 = vmatmul.mubr.msk.bf16.gmra.mrb[20].mxu1 %vm331_vm0, %v3300_v13 }
 0x5f1   :  { %3166 = vmatprep.mubr.msk.bf16.mxu1 %vm331_vm0, %v3305_v36 }
 0x6bb   :  { %v3136_v61 = vpop.f32.mrb[16].mxu1 }
 0x6bc   :  { %v1356_v6 = vpop.f32.mrb[17].mxu1  ;;  %v1388_v16 = vadd.f32 %v3136_v61, %v4190_v24  ;;  %v1491_v61 = vpop.permute.xlu0 %1490 }
 0x6bd   :  { %v1386_v7 = vadd.f32 %v1356_v6, %v4184_v18  ;;  %v3137_v8 = vpop.f32.mrb[18].mxu1 }
 0x6be   :  { %v1389_v37 = vadd.f32 %v3137_v8, %v4186_v19  ;;  %v1359_v14 = vpop.f32.mrb[19].mxu1  ;;  %v4297_v47 = vadd.f32 %v1414_v2, %v1388_v16 }
 0x6bf   :  { %v1387_v22 = vadd.f32 %v1359_v14, %v4188_v20  ;;  %v4291_v43 = vadd.f32 %v1404_v55, %v1386_v7 }
 0x6c0   :  { %v4293_v45 = vadd.f32 %v1419_v12, %v1389_v37 }
 0x6c1   :  { %v4295_v46 = vadd.f32 %v1409_v31, %v1387_v22 }
 0x6c2   :  { %v1452_v54 = vpack.c.bf16 %v4293_v45, %v4297_v47 }
 0x6c3   :  { %v3140_v48 = vpop.f32.mrb[20].mxu1  ;;  %v1451_v18 = vpack.c.bf16 %v4295_v46, %v4291_v43 }
 0x6c4   :  { %v1372_v19 = vpop.f32.mrb[21].mxu1  ;;  %v1392_v50 = vadd.f32 %v3140_v48, %v4199_v32 }
 0x6c5   :  { %v1390_v24 = vadd.f32 %v1372_v19, %v4201_v33  ;;  %v3141_v20 = vpop.f32.mrb[22].mxu1  ;;  %3142 = vmatprep.subr.bf16.mxu0 %v1451_v18 }
 0x6c6   :  { %v1375_v23 = vpop.f32.mrb[23].mxu1  ;;  %3143 = vmatpush3.bf16.msra.mxu0 %v1451_v18  ;;  %v4306_v26 = vadd.f32 %v1434_v28, %v1392_v50 }
 0x6c7   :  { %v1391_v57 = vadd.f32 %v1375_v23, %v4203_v34  ;;  %3144 = vmatprep.subr.bf16.mxu0 %v1452_v54  ;;  %v4308_v62 = vadd.f32 %v1424_v59, %v1390_v24 }
 0x6c8   :  { %v1454_v33 = vpack.c.bf16 %v4306_v26, %v4306_v26 }
 0x6c9   :  { %v4310_v25 = vadd.f32 %v1429_v29, %v1391_v57 }
 0x6ca   :  { %3145 = vmatpush3.bf16.msra.mxu0 %v1452_v54  ;;  %v1529_v34 = vsel %vm344_vm8, %v1454_v33, 0 }
 0x6cb   :  { %v1453_v32 = vpack.c.bf16 %v4310_v25, %v4308_v62 }
 0x6cd   :  { %3146 = vmatprep.subr.bf16.mxu0 %v1453_v32 }
 0x6ce   :  { %3147 = vmatpush3.bf16.msra.mxu0 %v1453_v32 }
 0x6cf   :  { %3256 = vmatprep.subr.msk.bf16.mxu0 %vm344_vm8, %v1454_v33 }
 0x6d2   :  { %3149 = vmatpush3.bf16.msra.mxu0 %v1529_v34 }
 0x6d5   :  { %3151 = vmatmul.mubr.msk.bf16.vlgmr.msra.gmra.mrb[24].mxu0 %vm331_vm0, %v3302_v58 }
 0x6d6   :  { %3154 = vmatprep.mubr.msk.bf16.mxu0 %vm331_vm0, %v3303_v63 }
 0x6dd   :  { %3155 = vmatmul.mubr.msk.bf16.gmra.mrb[28].mxu0 %vm331_vm0, %v3304_v38 }
 0x7a8   :  { %v3152_v40 = vpop.f32.mrb[24].mxu0 }
 0x7a9   :  { %v4334_v9 = vadd.f32 %v3152_v40, %v1476_v4  ;;  %v1565_v10 = vpop.f32.mrb[25].mxu0 }
 0x7aa   :  { %v4336_v15 = vadd.f32 %v1565_v10, %v1466_v0  ;;  %v3153_v17 = vpop.f32.mrb[26].mxu0 }
 0x7ab   :  { %v1597_v21 = vmin.f32 %v4334_v9, 20.0  ;;  %v4339_v27 = vadd.f32 %v3153_v17, %v1481_v42  ;;  %v1568_v39 = vpop.f32.mrb[27].mxu0  ;;  %vm1646_vm1 = vcmp.gt.f32.partialorder %v4334_v9, 20.0 }
 0x7ac   :  { %v1595_v51 = vmin.f32 %v4336_v15, 20.0  ;;  %v4342_v60 = vadd.f32 %v1568_v39, %v1471_v3  ;;  %vm1644_vm3 = vcmp.gt.f32.partialorder %v4336_v15, 20.0 }
 0x7ad   :  { %v1606_v49 = vmul.f32 1.442695, %v1597_v21  ;;  %v1598_v44 = vmin.f32 %v4339_v27, 20.0  ;;  %vm1647_vm2 = vcmp.gt.f32.partialorder %v4339_v27, 20.0 }
 0x7ae   :  { %v1602_v52 = vmul.f32 1.442695, %v1595_v51  ;;  %v1596_v30 = vmin.f32 %v4342_v60, 20.0  ;;  %vm1645_vm4 = vcmp.gt.f32.partialorder %v4342_v60, 20.0 }
 0x7af   :  { %3437 = vpow2.f32 %v1606_v49  ;;  %v1608_v56 = vmul.f32 1.442695, %v1598_v44 }
 0x7b0   :  { %3439 = vpow2.f32 %v1602_v52  ;;  %v1604_v5 = vmul.f32 1.442695, %v1596_v30  ;;  %v3156_v35 = vpop.f32.mrb[28].mxu0 }
 0x7b1   :  { %3441 = vpow2.f32 %v1608_v56  ;;  %v4346_v13 = vadd.f32 %v3156_v35, %v1496_v53  ;;  %v1581_v41 = vpop.f32.mrb[29].mxu0 }
 0x7b2   :  { %3443 = vpow2.f32 %v1604_v5  ;;  %v4348_v55 = vadd.f32 %v1581_v41, %v1486_v11  ;;  %v3157_v31 = vpop.f32.mrb[30].mxu0 }
 0x7b3   :  { %v1601_v2 = vmin.f32 %v4346_v13, 20.0  ;;  %v1584_v6 = vpop.f32.mrb[31].mxu0  ;;  %vm1650_vm5 = vcmp.gt.f32.partialorder %v4346_v13, 20.0 }
 0x7b4   :  { %v1599_v7 = vmin.f32 %v4348_v55, 20.0  ;;  %v4352_v8 = vadd.f32 %v1584_v6, %v1491_v61  ;;  %vm1648_vm6 = vcmp.gt.f32.partialorder %v4348_v55, 20.0 }
 0x7b5   :  { %v1614_v37 = vmul.f32 1.442695, %v1601_v2 }
 0x7b6   :  { %v1610_v14 = vmul.f32 1.442695, %v1599_v7  ;;  %v1600_v16 = vmin.f32 %v4352_v8, 20.0  ;;  %vm1649_vm7 = vcmp.gt.f32.partialorder %v4352_v8, 20.0 }
 0x7b7   :  { %3445 = vpow2.f32 %v1614_v37 }
 0x7b8   :  { %3447 = vpow2.f32 %v1610_v14  ;;  %v1612_v22 = vmul.f32 1.442695, %v1600_v16 }
 0x7b9   :  { %v3438_v12 = vpop.eup %3437 }
 0x7ba   :  { %v3440_v59 = vpop.eup %3439  ;;  %v1618_v48 = vadd.f32 2.0, %v3438_v12  ;;  %3449 = vpow2.f32 %v1612_v22 }
 0x7bb   :  { %v3442_v18 = vpop.eup %3441  ;;  %v1616_v19 = vadd.f32 2.0, %v3440_v59 }
 0x7bc   :  { %v3444_v50 = vpop.eup %3443  ;;  %v1625_v24 = vmul.f32 %v3438_v12, %v1618_v48  ;;  %v1619_v20 = vadd.f32 2.0, %v3442_v18 }
 0x7bd   :  { %v1623_v54 = vmul.f32 %v3440_v59, %v1616_v19  ;;  %v1617_v23 = vadd.f32 2.0, %v3444_v50 }
 0x7be   :  { %v1632_v57 = vadd.f32 2.0, %v1625_v24  ;;  %v1626_v28 = vmul.f32 %v3442_v18, %v1619_v20  ;;  %v1653_v17 = vmul.f32 %v1625_v24, %v4334_v9 }
 0x7bf   :  { %v1630_v29 = vadd.f32 2.0, %v1623_v54  ;;  %v1624_v32 = vmul.f32 %v3444_v50, %v1617_v23  ;;  %v1651_v51 = vmul.f32 %v1623_v54, %v4336_v15  ;;  %v3306_v54 = vld [vmem:[%s4635_s5 + $0x5c] sm:$0xff]   ;;  %v1799_v23 = vpop.permute.xlu0 %1798 }
 0x7c0   :  { %3451 = vrcp.f32 %v1632_v57  ;;  %v1633_v33 = vadd.f32 2.0, %v1626_v28  ;;  %v1654_v44 = vmul.f32 %v1626_v28, %v4339_v27  ;;  %v1804_v57 = vpop.permute.xlu1 %1803 }
 0x7c1   :  { %v3446_v34 = vpop.eup %3445  ;;  %3453 = vrcp.f32 %v1630_v29  ;;  %v1631_v58 = vadd.f32 2.0, %v1624_v32  ;;  %v1652_v56 = vmul.f32 %v1624_v32, %v4342_v60 }
 0x7c2   :  { %v3448_v63 = vpop.eup %3447  ;;  %3455 = vrcp.f32 %v1633_v33  ;;  %v1622_v38 = vadd.f32 2.0, %v3446_v34 }
 0x7c3   :  { %3457 = vrcp.f32 %v1631_v58  ;;  %v1620_v36 = vadd.f32 2.0, %v3448_v63  ;;  %v1809_v29 = vpop.permute.xlu0 %1808 }
 0x7c4   :  { %v3450_v0 = vpop.eup %3449  ;;  %v1629_v3 = vmul.f32 %v3446_v34, %v1622_v38 }
 0x7c5   :  { %v1627_v4 = vmul.f32 %v3448_v63, %v1620_v36  ;;  %v1621_v40 = vadd.f32 2.0, %v3450_v0 }
 0x7c6   :  { %v1636_v42 = vadd.f32 2.0, %v1629_v3  ;;  %v1657_v16 = vmul.f32 %v1629_v3, %v4346_v13 }
 0x7c7   :  { %v1634_v10 = vadd.f32 2.0, %v1627_v4  ;;  %v1628_v11 = vmul.f32 %v3450_v0, %v1621_v40  ;;  %v1655_v22 = vmul.f32 %v1627_v4, %v4348_v55  ;;  %v1814_v0 = vpop.permute.xlu1 %1813 }
 0x7c8   :  { %3459 = vrcp.f32 %v1636_v42  ;;  %v1819_v42 = vpop.permute.xlu0 %1818 }
 0x7c9   :  { %3461 = vrcp.f32 %v1634_v10  ;;  %v1635_v21 = vadd.f32 2.0, %v1628_v11  ;;  %v1656_v48 = vmul.f32 %v1628_v11, %v4352_v8 }
 0x7ca   :  { %v3452_v39 = vpop.eup %3451 }
 0x7cb   :  { %v3454_v49 = vpop.eup %3453  ;;  %3463 = vrcp.f32 %v1635_v21  ;;  %v1660_v52 = vmul.f32 %v3452_v39, %v1653_v17 }
 0x7cc   :  { %v3456_v30 = vpop.eup %3455  ;;  %v1658_v53 = vmul.f32 %v3454_v49, %v1651_v51  ;;  %v1829_v49 = vpop.permute.xlu0 %1828 }
 0x7cd   :  { %v3458_v5 = vpop.eup %3457  ;;  %v1661_v35 = vmul.f32 %v3456_v30, %v1654_v44  ;;  %v1667_v31 = vsel %vm1646_vm1, %v4334_v9, %v1660_v52  ;;  %v1824_v44 = vpop.permute.xlu1 %1823 }
 0x7ce   :  { %v1659_v41 = vmul.f32 %v3458_v5, %v1652_v56  ;;  %v1665_v2 = vsel %vm1644_vm3, %v4336_v15, %v1658_v53  ;;  %v3310_v53 = vld [vmem:[%s4633_s3 + $0x78] sm:$0xff]   ;;  %v3311_v5 = vld [vmem:[%s4633_s3 + $0x80] sm:$0xff]  }
 0x7cf   :  { %v1668_v61 = vsel %vm1647_vm2, %v4339_v27, %v1661_v35  ;;  %v3312_v35 = vld [vmem:[%s4633_s3 + $0x88] ss:$0 sps:$4 sm:$0x11]  }
 0x7d0   :  { %v1666_v6 = vsel %vm1645_vm4, %v4342_v60, %v1659_v41  ;;  %v1681_v7 = vpack.c.bf16 %v1668_v61, %v1667_v31  ;;  %v3313_v41 = vld [vmem:[%s4635_s5 + $0x70] sm:$0xff]   ;;  %v1866_v61 = vpop.permute.xlu0 %1865 }
 0x7d1   :  { %v1680_v37 = vpack.c.bf16 %v1666_v6, %v1665_v2  ;;  %v1861_v31 = vpop.permute.xlu1 %1860 }
 0x7d2   :  { %v3460_v14 = vpop.eup %3459 }
 0x7d3   :  { %v3462_v12 = vpop.eup %3461  ;;  %3158 = vmatprep.subr.bf16.mxu1 %v1680_v37  ;;  %v1664_v59 = vmul.f32 %v3460_v14, %v1657_v16 }
 0x7d4   :  { %3159 = vmatpush3.bf16.msra.mxu1 %v1680_v37  ;;  %v1662_v9 = vmul.f32 %v3462_v12, %v1655_v22 }
 0x7d5   :  { %v3464_v18 = vpop.eup %3463  ;;  %3160 = vmatprep.subr.bf16.mxu1 %v1681_v7  ;;  %v1671_v19 = vsel %vm1650_vm5, %v4346_v13, %v1664_v59  ;;  %v3308_v13 = vld [vmem:[%s4635_s5 + $0x6c] ss:$0 sps:$4 sm:$0x11]   ;;  %v1871_v2 = vpop.permute.xlu1 %1870 }
 0x7d6   :  { %v1663_v27 = vmul.f32 %v3464_v18, %v1656_v48  ;;  %v1669_v15 = vsel %vm1648_vm6, %v4348_v55, %v1662_v9  ;;  %v1683_v24 = vpack.c.bf16 %v1671_v19, %v1671_v19  ;;  %v3307_v55 = vld [vmem:[%s4635_s5 + $0x64] sm:$0xff]  }
 0x7d8   :  { %3161 = vmatpush3.bf16.msra.mxu1 %v1681_v7  ;;  %v1670_v60 = vsel %vm1649_vm7, %v4352_v8, %v1663_v27  ;;  %v1715_v20 = vsel %vm344_vm8, %v1683_v24, 0  ;;  %v3309_v8 = vld [vmem:[%s4633_s3 + $0x70] sm:$0xff]   ;;  %v1876_v7 = vpop.permute.xlu0 %1875 }
 0x7d9   :  { %v1682_v50 = vpack.c.bf16 %v1670_v60, %v1669_v15  ;;  %3182 = vmatprep.mubr.msk.bf16.mxu0 %vm331_vm0, %v3309_v8  ;;  %v1881_v16 = vpop.permute.xlu1 %1880 }
 0x7db   :  { %3162 = vmatprep.subr.bf16.mxu1 %v1682_v50 }
 0x7dc   :  { %3163 = vmatpush3.bf16.msra.mxu1 %v1682_v50 }
 0x7dd   :  { %3257 = vmatprep.subr.msk.bf16.mxu1 %vm344_vm8, %v1683_v24 }
 0x7e0   :  { %3165 = vmatpush3.bf16.msra.mxu1 %v1715_v20  ;;  %v1891_v20 = vpop.permute.xlu1 %1890 }
 0x7e3   :  { %3167 = vmatmul.mubr.msk.bf16.vlgmr.msra.gmra.mrb[24].mxu1 %vm331_vm0, %v3306_v54 }
 0x7e4   :  { %3170 = vmatprep.mubr.msk.bf16.mxu1 %vm331_vm0, %v3307_v55 }
 0x7eb   :  { %3171 = vmatmul.mubr.msk.bf16.gmra.mrb[28].mxu1 %vm331_vm0, %v3308_v13 }
 0x7ec   :  { %3198 = vmatprep.mubr.msk.bf16.mxu1 %vm331_vm0, %v3313_v41 }
 0x8b6   :  { %v3168_v28 = vpop.f32.mrb[24].mxu1 }
 0x8b7   :  { %v1751_v32 = vpop.f32.mrb[25].mxu1  ;;  %v1783_v38 = vadd.f32 %v3168_v28, %v4297_v47  ;;  %v1886_v28 = vpop.permute.xlu0 %1885 }
 0x8b8   :  { %v1781_v33 = vadd.f32 %v1751_v32, %v4291_v43  ;;  %v3169_v34 = vpop.f32.mrb[26].mxu1 }
 0x8b9   :  { %v1784_v58 = vadd.f32 %v3169_v34, %v4293_v45  ;;  %v1754_v63 = vpop.f32.mrb[27].mxu1  ;;  %v4404_v10 = vadd.f32 %v1809_v29, %v1783_v38 }
 0x8ba   :  { %v1782_v36 = vadd.f32 %v1754_v63, %v4295_v46  ;;  %v4398_v3 = vadd.f32 %v1799_v23, %v1781_v33 }
 0x8bb   :  { %v4400_v4 = vadd.f32 %v1814_v0, %v1784_v58 }
 0x8bc   :  { %v4402_v40 = vadd.f32 %v1804_v57, %v1782_v36 }
 0x8bd   :  { %v1847_v21 = vpack.c.bf16 %v4400_v4, %v4404_v10 }
 0x8be   :  { %v3172_v11 = vpop.f32.mrb[28].mxu1  ;;  %v1846_v43 = vpack.c.bf16 %v4402_v40, %v4398_v3 }
 0x8bf   :  { %v1767_v45 = vpop.f32.mrb[29].mxu1  ;;  %v1787_v17 = vadd.f32 %v3172_v11, %v4306_v26 }
 0x8c0   :  { %v1785_v47 = vadd.f32 %v1767_v45, %v4308_v62  ;;  %v3173_v46 = vpop.f32.mrb[30].mxu1  ;;  %3174 = vmatprep.subr.bf16.mxu0 %v1846_v43 }
 0x8c1   :  { %v1770_v39 = vpop.f32.mrb[31].mxu1  ;;  %3175 = vmatpush3.bf16.msra.mxu0 %v1846_v43  ;;  %v4413_v52 = vadd.f32 %v1829_v49, %v1787_v17 }
 0x8c2   :  { %v1786_v51 = vadd.f32 %v1770_v39, %v4310_v25  ;;  %3176 = vmatprep.subr.bf16.mxu0 %v1847_v21  ;;  %v4415_v30 = vadd.f32 %v1819_v42, %v1785_v47 }
 0x8c3   :  { %v1849_v62 = vpack.c.bf16 %v4413_v52, %v4413_v52 }
 0x8c4   :  { %v4417_v56 = vadd.f32 %v1824_v44, %v1786_v51 }
 0x8c5   :  { %3177 = vmatpush3.bf16.msra.mxu0 %v1847_v21  ;;  %v1924_v25 = vsel %vm344_vm8, %v1849_v62, 0 }
 0x8c6   :  { %v1848_v26 = vpack.c.bf16 %v4417_v56, %v4415_v30 }
 0x8c8   :  { %3178 = vmatprep.subr.bf16.mxu0 %v1848_v26 }
 0x8c9   :  { %3179 = vmatpush3.bf16.msra.mxu0 %v1848_v26 }
 0x8ca   :  { %3258 = vmatprep.subr.msk.bf16.mxu0 %vm344_vm8, %v1849_v62 }
 0x8cd   :  { %3181 = vmatpush3.bf16.msra.mxu0 %v1924_v25 }
 0x8d0   :  { %3183 = vmatmul.mubr.msk.bf16.vlgmr.msra.gmra.mrb[32].mxu0 %vm331_vm0, %v3310_v53 }
 0x8d1   :  { %3186 = vmatprep.mubr.msk.bf16.mxu0 %vm331_vm0, %v3311_v5 }
 0x8d8   :  { %3187 = vmatmul.mubr.msk.bf16.gmra.mrb[36].mxu0 %vm331_vm0, %v3312_v35 }
 0x9a3   :  { %v3184_v6 = vpop.f32.mrb[32].mxu0 }
 0x9a4   :  { %v4441_v37 = vadd.f32 %v3184_v6, %v1871_v2  ;;  %v1960_v14 = vpop.f32.mrb[33].mxu0 }
 0x9a5   :  { %v4443_v22 = vadd.f32 %v1960_v14, %v1861_v31  ;;  %v3185_v12 = vpop.f32.mrb[34].mxu0 }
 0x9a6   :  { %v1992_v59 = vmin.f32 %v4441_v37, 20.0  ;;  %v4446_v48 = vadd.f32 %v3185_v12, %v1876_v7  ;;  %v1963_v9 = vpop.f32.mrb[35].mxu0  ;;  %vm2041_vm9 = vcmp.gt.f32.partialorder %v4441_v37, 20.0 }
 0x9a7   :  { %v1990_v18 = vmin.f32 %v4443_v22, 20.0  ;;  %v4449_v27 = vadd.f32 %v1963_v9, %v1866_v61  ;;  %vm2039_vm11 = vcmp.gt.f32.partialorder %v4443_v22, 20.0 }
 0x9a8   :  { %v2001_v15 = vmul.f32 1.442695, %v1992_v59  ;;  %v1993_v60 = vmin.f32 %v4446_v48, 20.0  ;;  %vm2042_vm10 = vcmp.gt.f32.partialorder %v4446_v48, 20.0 }
 0x9a9   :  { %v1997_v19 = vmul.f32 1.442695, %v1990_v18  ;;  %v1991_v50 = vmin.f32 %v4449_v27, 20.0  ;;  %vm2040_vm12 = vcmp.gt.f32.partialorder %v4449_v27, 20.0 }
 0x9aa   :  { %3465 = vpow2.f32 %v2001_v15  ;;  %v2003_v24 = vmul.f32 1.442695, %v1993_v60 }
 0x9ab   :  { %3467 = vpow2.f32 %v1997_v19  ;;  %v1999_v54 = vmul.f32 1.442695, %v1991_v50  ;;  %v3188_v55 = vpop.f32.mrb[36].mxu0 }
 0x9ac   :  { %3469 = vpow2.f32 %v2003_v24  ;;  %v4453_v13 = vadd.f32 %v3188_v55, %v1891_v20  ;;  %v1976_v8 = vpop.f32.mrb[37].mxu0 }
 0x9ad   :  { %3471 = vpow2.f32 %v1999_v54  ;;  %v4455_v23 = vadd.f32 %v1976_v8, %v1881_v16  ;;  %v3189_v57 = vpop.f32.mrb[38].mxu0 }
 0x9ae   :  { %v1996_v29 = vmin.f32 %v4453_v13, 20.0  ;;  %v1979_v32 = vpop.f32.mrb[39].mxu0  ;;  %vm2045_vm13 = vcmp.gt.f32.partialorder %v4453_v13, 20.0 }
 0x9af   :  { %v1994_v33 = vmin.f32 %v4455_v23, 20.0  ;;  %v4459_v34 = vadd.f32 %v1979_v32, %v1886_v28  ;;  %vm2043_vm14 = vcmp.gt.f32.partialorder %v4455_v23, 20.0 }
 0x9b0   :  { %v2009_v58 = vmul.f32 1.442695, %v1996_v29 }
 0x9b1   :  { %v2005_v63 = vmul.f32 1.442695, %v1994_v33  ;;  %v1995_v38 = vmin.f32 %v4459_v34, 20.0  ;;  %vm2044_vm15 = vcmp.gt.f32.partialorder %v4459_v34, 20.0 }
 0x9b2   :  { %3473 = vpow2.f32 %v2009_v58 }
 0x9b3   :  { %3475 = vpow2.f32 %v2005_v63  ;;  %v2007_v36 = vmul.f32 1.442695, %v1995_v38 }
 0x9b4   :  { %v3466_v0 = vpop.eup %3465 }
 0x9b5   :  { %v3468_v42 = vpop.eup %3467  ;;  %v2013_v11 = vadd.f32 2.0, %v3466_v0  ;;  %3477 = vpow2.f32 %v2007_v36 }
 0x9b6   :  { %v3470_v43 = vpop.eup %3469  ;;  %v2011_v45 = vadd.f32 2.0, %v3468_v42 }
 0x9b7   :  { %v3472_v17 = vpop.eup %3471  ;;  %v2020_v47 = vmul.f32 %v3466_v0, %v2013_v11  ;;  %v2014_v46 = vadd.f32 2.0, %v3470_v43 }
 0x9b8   :  { %v2018_v21 = vmul.f32 %v3468_v42, %v2011_v45  ;;  %v2012_v39 = vadd.f32 2.0, %v3472_v17 }
 0x9b9   :  { %v2027_v51 = vadd.f32 2.0, %v2020_v47  ;;  %v2021_v49 = vmul.f32 %v3470_v43, %v2014_v46  ;;  %v2048_v12 = vmul.f32 %v2020_v47, %v4441_v37 }
 0x9ba   :  { %v2025_v44 = vadd.f32 2.0, %v2018_v21  ;;  %v2019_v26 = vmul.f32 %v3472_v17, %v2012_v39  ;;  %v2046_v18 = vmul.f32 %v2018_v21, %v4443_v22  ;;  %v3314_v21 = vld [vmem:[%s4635_s5 + $0x78] sm:$0xff]   ;;  %v2194_v39 = vpop.permute.xlu0 %2193 }
 0x9bb   :  { %3479 = vrcp.f32 %v2027_v51  ;;  %v2028_v62 = vadd.f32 2.0, %v2021_v49  ;;  %v2049_v60 = vmul.f32 %v2021_v49, %v4446_v48  ;;  %v2199_v51 = vpop.permute.xlu1 %2198 }
 0x9bc   :  { %v3474_v25 = vpop.eup %3473  ;;  %3481 = vrcp.f32 %v2025_v44  ;;  %v2026_v53 = vadd.f32 2.0, %v2019_v26  ;;  %v2047_v24 = vmul.f32 %v2019_v26, %v4449_v27 }
 0x9bd   :  { %v3476_v5 = vpop.eup %3475  ;;  %3483 = vrcp.f32 %v2028_v62  ;;  %v2017_v35 = vadd.f32 2.0, %v3474_v25 }
 0x9be   :  { %3485 = vrcp.f32 %v2026_v53  ;;  %v2015_v41 = vadd.f32 2.0, %v3476_v5  ;;  %v2204_v44 = vpop.permute.xlu0 %2203 }
 0x9bf   :  { %v3478_v31 = vpop.eup %3477  ;;  %v2024_v61 = vmul.f32 %v3474_v25, %v2017_v35 }
 0x9c0   :  { %v2022_v2 = vmul.f32 %v3476_v5, %v2015_v41  ;;  %v2016_v6 = vadd.f32 2.0, %v3478_v31 }
 0x9c1   :  { %v2031_v7 = vadd.f32 2.0, %v2024_v61  ;;  %v2052_v38 = vmul.f32 %v2024_v61, %v4453_v13 }
 0x9c2   :  { %v2029_v14 = vadd.f32 2.0, %v2022_v2  ;;  %v2023_v16 = vmul.f32 %v3478_v31, %v2016_v6  ;;  %v2050_v36 = vmul.f32 %v2022_v2, %v4455_v23  ;;  %v2209_v31 = vpop.permute.xlu1 %2208 }
 0x9c3   :  { %3487 = vrcp.f32 %v2031_v7  ;;  %v2214_v7 = vpop.permute.xlu0 %2213 }
 0x9c4   :  { %3489 = vrcp.f32 %v2029_v14  ;;  %v2030_v59 = vadd.f32 2.0, %v2023_v16  ;;  %v2051_v11 = vmul.f32 %v2023_v16, %v4459_v34 }
 0x9c5   :  { %v3480_v9 = vpop.eup %3479 }
 0x9c6   :  { %v3482_v15 = vpop.eup %3481  ;;  %3491 = vrcp.f32 %v2030_v59  ;;  %v2055_v19 = vmul.f32 %v3480_v9, %v2048_v12 }
 0x9c7   :  { %v3484_v50 = vpop.eup %3483  ;;  %v2053_v20 = vmul.f32 %v3482_v15, %v2046_v18  ;;  %v2224_v15 = vpop.permute.xlu0 %2223 }
 0x9c8   :  { %v3486_v54 = vpop.eup %3485  ;;  %v2056_v55 = vmul.f32 %v3484_v50, %v2049_v60  ;;  %v2062_v57 = vsel %vm2041_vm9, %v4441_v37, %v2055_v19  ;;  %v2219_v60 = vpop.permute.xlu1 %2218  ;;  %vm3550_vm9 = vmmov 0  }
 0x9c9   :  { %v2054_v8 = vmul.f32 %v3486_v54, %v2047_v24  ;;  %v2060_v29 = vsel %vm2039_vm11, %v4443_v22, %v2053_v20  ;;  %v3318_v20 = vld [vmem:[%s4633_s3 + $0x94] sm:$0xff]   ;;  %v3319_v54 = vld [vmem:[%s4633_s3 + $0x9c] sm:$0xff]   ;;  %vm2688_vm11 = vcmp.eq.s32.totalorder %v3785_v1, 3 }
 0x9ca   :  { %v2063_v28 = vsel %vm2042_vm10, %v4446_v48, %v2056_v55  ;;  %v3320_v55 = vld [vmem:[%s4633_s3 + $0xa4] ss:$0 sps:$4 sm:$0x11]   ;;  %vm2687_vm10 = vcmp.eq.s32.totalorder %v3785_v1, 0 }
 0x9cb   :  { %v2061_v32 = vsel %vm2040_vm12, %v4449_v27, %v2054_v8  ;;  %v2076_v33 = vpack.c.bf16 %v2063_v28, %v2062_v57  ;;  %v3321_v8 = vld [vmem:[%s4635_s5 + $0x8c] sm:$0xff]   ;;  %v2261_v28 = vpop.permute.xlu0 %2260 }
 0x9cc   :  { %v2075_v58 = vpack.c.bf16 %v2061_v32, %v2060_v29  ;;  %v2256_v57 = vpop.permute.xlu1 %2255 }
 0x9cd   :  { %v3488_v63 = vpop.eup %3487 }
 0x9ce   :  { %v3490_v0 = vpop.eup %3489  ;;  %3190 = vmatprep.subr.bf16.mxu1 %v2075_v58  ;;  %v2059_v42 = vmul.f32 %v3488_v63, %v2052_v38 }
 0x9cf   :  { %3191 = vmatpush3.bf16.msra.mxu1 %v2075_v58  ;;  %v2057_v37 = vmul.f32 %v3490_v0, %v2050_v36 }
 0x9d0   :  { %v3492_v43 = vpop.eup %3491  ;;  %3192 = vmatprep.subr.bf16.mxu1 %v2076_v33  ;;  %v2066_v45 = vsel %vm2045_vm13, %v4453_v13, %v2059_v42  ;;  %v3316_v13 = vld [vmem:[%s4635_s5 + $0x88] ss:$0 sps:$4 sm:$0x11]   ;;  %v2266_v29 = vpop.permute.xlu1 %2265 }
 0x9d1   :  { %v2058_v48 = vmul.f32 %v3492_v43, %v2051_v11  ;;  %v2064_v22 = vsel %vm2043_vm14, %v4455_v23, %v2057_v37  ;;  %v2078_v47 = vpack.c.bf16 %v2066_v45, %v2066_v45  ;;  %v3315_v23 = vld [vmem:[%s4635_s5 + $0x80] sm:$0xff]  }
 0x9d3   :  { %3193 = vmatpush3.bf16.msra.mxu1 %v2076_v33  ;;  %v2065_v27 = vsel %vm2044_vm15, %v4459_v34, %v2058_v48  ;;  %v2110_v46 = vsel %vm344_vm8, %v2078_v47, 0  ;;  %v3317_v34 = vld [vmem:[%s4633_s3 + $0x8c] sm:$0xff]   ;;  %v2271_v33 = vpop.permute.xlu0 %2270 }
 0x9d4   :  { %v2077_v17 = vpack.c.bf16 %v2065_v27, %v2064_v22  ;;  %3214 = vmatprep.mubr.msk.bf16.mxu0 %vm331_vm0, %v3317_v34  ;;  %v2276_v38 = vpop.permute.xlu1 %2275 }
 0x9d6   :  { %3194 = vmatprep.subr.bf16.mxu1 %v2077_v17 }
 0x9d7   :  { %3195 = vmatpush3.bf16.msra.mxu1 %v2077_v17 }
 0x9d8   :  { %3259 = vmatprep.subr.msk.bf16.mxu1 %vm344_vm8, %v2078_v47 }
 0x9db   :  { %3197 = vmatpush3.bf16.msra.mxu1 %v2110_v46  ;;  %v2286_v46 = vpop.permute.xlu1 %2285 }
 0x9de   :  { %3199 = vmatmul.mubr.msk.bf16.vlgmr.msra.gmra.mrb[32].mxu1 %vm331_vm0, %v3314_v21 }
 0x9df   :  { %3202 = vmatprep.mubr.msk.bf16.mxu1 %vm331_vm0, %v3315_v23 }
 0x9e6   :  { %3203 = vmatmul.mubr.msk.bf16.gmra.mrb[36].mxu1 %vm331_vm0, %v3316_v13 }
 0x9e7   :  { %3230 = vmatprep.mubr.msk.bf16.mxu1 %vm331_vm0, %v3321_v8 }
 0xab1   :  { %v3200_v49 = vpop.f32.mrb[32].mxu1 }
 0xab2   :  { %v2146_v26 = vpop.f32.mrb[33].mxu1  ;;  %v2178_v35 = vadd.f32 %v3200_v49, %v4404_v10  ;;  %v2281_v49 = vpop.permute.xlu0 %2280 }
 0xab3   :  { %v2176_v62 = vadd.f32 %v2146_v26, %v4398_v3  ;;  %v3201_v25 = vpop.f32.mrb[34].mxu1 }
 0xab4   :  { %v2179_v53 = vadd.f32 %v3201_v25, %v4400_v4  ;;  %v2149_v5 = vpop.f32.mrb[35].mxu1  ;;  %v4511_v14 = vadd.f32 %v2204_v44, %v2178_v35 }
 0xab5   :  { %v2177_v41 = vadd.f32 %v2149_v5, %v4402_v40  ;;  %v4505_v61 = vadd.f32 %v2194_v39, %v2176_v62 }
 0xab6   :  { %v4507_v2 = vadd.f32 %v2209_v31, %v2179_v53 }
 0xab7   :  { %v4509_v6 = vadd.f32 %v2199_v51, %v2177_v41 }
 0xab8   :  { %v2242_v59 = vpack.c.bf16 %v4507_v2, %v4511_v14 }
 0xab9   :  { %v3204_v16 = vpop.f32.mrb[36].mxu1  ;;  %v2241_v3 = vpack.c.bf16 %v4509_v6, %v4505_v61 }
 0xaba   :  { %v2162_v4 = vpop.f32.mrb[37].mxu1  ;;  %v2182_v12 = vadd.f32 %v3204_v16, %v4413_v52 }
 0xabb   :  { %v2180_v10 = vadd.f32 %v2162_v4, %v4415_v30  ;;  %v3205_v40 = vpop.f32.mrb[38].mxu1  ;;  %3206 = vmatprep.subr.bf16.mxu0 %v2241_v3 }
 0xabc   :  { %v2165_v9 = vpop.f32.mrb[39].mxu1  ;;  %3207 = vmatpush3.bf16.msra.mxu0 %v2241_v3  ;;  %v4520_v19 = vadd.f32 %v2224_v15, %v2182_v12 }
 0xabd   :  { %v2181_v18 = vadd.f32 %v2165_v9, %v4417_v56  ;;  %3208 = vmatprep.subr.bf16.mxu0 %v2242_v59  ;;  %v4522_v50 = vadd.f32 %v2214_v7, %v2180_v10 }
 0xabe   :  { %v2244_v30 = vpack.c.bf16 %v4520_v19, %v4520_v19 }
 0xabf   :  { %v4524_v24 = vadd.f32 %v2219_v60, %v2181_v18 }
 0xac0   :  { %3209 = vmatpush3.bf16.msra.mxu0 %v2242_v59  ;;  %v2319_v56 = vsel %vm344_vm8, %v2244_v30, 0 }
 0xac1   :  { %v2243_v52 = vpack.c.bf16 %v4524_v24, %v4522_v50 }
 0xac3   :  { %3210 = vmatprep.subr.bf16.mxu0 %v2243_v52 }
 0xac4   :  { %3211 = vmatpush3.bf16.msra.mxu0 %v2243_v52 }
 0xac5   :  { %3260 = vmatprep.subr.msk.bf16.mxu0 %vm344_vm8, %v2244_v30 }
 0xac8   :  { %3213 = vmatpush3.bf16.msra.mxu0 %v2319_v56 }
 0xacb   :  { %3215 = vmatmul.mubr.msk.bf16.vlgmr.msra.gmra.mrb[40].mxu0 %vm331_vm0, %v3318_v20 }
 0xacc   :  { %3218 = vmatprep.mubr.msk.bf16.mxu0 %vm331_vm0, %v3319_v54 }
 0xad3   :  { %3219 = vmatmul.mubr.msk.bf16.gmra.mrb[44].mxu0 %vm331_vm0, %v3320_v55 }
 0xb9e   :  { %v3216_v32 = vpop.f32.mrb[40].mxu0 }
 0xb9f   :  { %v4548_v58 = vadd.f32 %v3216_v32, %v2266_v29  ;;  %v2355_v63 = vpop.f32.mrb[41].mxu0 }
 0xba0   :  { %v4550_v36 = vadd.f32 %v2355_v63, %v2256_v57  ;;  %v3217_v0 = vpop.f32.mrb[42].mxu0 }
 0xba1   :  { %v2387_v42 = vmin.f32 %v4548_v58, 20.0  ;;  %v4553_v11 = vadd.f32 %v3217_v0, %v2271_v33  ;;  %v2358_v37 = vpop.f32.mrb[43].mxu0  ;;  %vm2436_vm1 = vcmp.gt.f32.partialorder %v4548_v58, 20.0 }
 0xba2   :  { %v2385_v43 = vmin.f32 %v4550_v36, 20.0  ;;  %v4556_v48 = vadd.f32 %v2358_v37, %v2261_v28  ;;  %vm2434_vm3 = vcmp.gt.f32.partialorder %v4550_v36, 20.0 }
 0xba3   :  { %v2396_v22 = vmul.f32 1.442695, %v2387_v42  ;;  %v2388_v27 = vmin.f32 %v4553_v11, 20.0  ;;  %vm2437_vm2 = vcmp.gt.f32.partialorder %v4553_v11, 20.0 }
 0xba4   :  { %v2392_v45 = vmul.f32 1.442695, %v2385_v43  ;;  %v2386_v17 = vmin.f32 %v4556_v48, 20.0  ;;  %vm2435_vm4 = vcmp.gt.f32.partialorder %v4556_v48, 20.0 }
 0xba5   :  { %3493 = vpow2.f32 %v2396_v22  ;;  %v2398_v47 = vmul.f32 1.442695, %v2388_v27 }
 0xba6   :  { %3495 = vpow2.f32 %v2392_v45  ;;  %v2394_v21 = vmul.f32 1.442695, %v2386_v17  ;;  %v3220_v23 = vpop.f32.mrb[44].mxu0 }
 0xba7   :  { %3497 = vpow2.f32 %v2398_v47  ;;  %v4560_v13 = vadd.f32 %v3220_v23, %v2286_v46  ;;  %v2371_v34 = vpop.f32.mrb[45].mxu0 }
 0xba8   :  { %3499 = vpow2.f32 %v2394_v21  ;;  %v4562_v39 = vadd.f32 %v2371_v34, %v2276_v38  ;;  %v3221_v51 = vpop.f32.mrb[46].mxu0 }
 0xba9   :  { %v2391_v44 = vmin.f32 %v4560_v13, 20.0  ;;  %v2374_v26 = vpop.f32.mrb[47].mxu0  ;;  %vm2440_vm5 = vcmp.gt.f32.partialorder %v4560_v13, 20.0 }
 0xbaa   :  { %v2389_v62 = vmin.f32 %v4562_v39, 20.0  ;;  %v4566_v25 = vadd.f32 %v2374_v26, %v2281_v49  ;;  %vm2438_vm6 = vcmp.gt.f32.partialorder %v4562_v39, 20.0 }
 0xbab   :  { %v2404_v53 = vmul.f32 1.442695, %v2391_v44 }
 0xbac   :  { %v2400_v5 = vmul.f32 1.442695, %v2389_v62  ;;  %v2390_v35 = vmin.f32 %v4566_v25, 20.0  ;;  %vm2439_vm7 = vcmp.gt.f32.partialorder %v4566_v25, 20.0 }
 0xbad   :  { %3501 = vpow2.f32 %v2404_v53 }
 0xbae   :  { %3503 = vpow2.f32 %v2400_v5  ;;  %v2402_v41 = vmul.f32 1.442695, %v2390_v35 }
 0xbaf   :  { %v3494_v31 = vpop.eup %3493 }
 0xbb0   :  { %v3496_v7 = vpop.eup %3495  ;;  %v2408_v16 = vadd.f32 2.0, %v3494_v31  ;;  %3505 = vpow2.f32 %v2402_v41 }
 0xbb1   :  { %v3498_v3 = vpop.eup %3497  ;;  %v2406_v4 = vadd.f32 2.0, %v3496_v7 }
 0xbb2   :  { %v3500_v12 = vpop.eup %3499  ;;  %v2415_v10 = vmul.f32 %v3494_v31, %v2408_v16  ;;  %v2409_v40 = vadd.f32 2.0, %v3498_v3 }
 0xbb3   :  { %v2413_v59 = vmul.f32 %v3496_v7, %v2406_v4  ;;  %v2407_v9 = vadd.f32 2.0, %v3500_v12 }
 0xbb4   :  { %v2422_v18 = vadd.f32 2.0, %v2415_v10  ;;  %v2416_v15 = vmul.f32 %v3498_v3, %v2409_v40  ;;  %v2443_v0 = vmul.f32 %v2415_v10, %v4548_v58 }
 0xbb5   :  { %v2420_v60 = vadd.f32 2.0, %v2413_v59  ;;  %v2414_v52 = vmul.f32 %v3500_v12, %v2407_v9  ;;  %v2441_v43 = vmul.f32 %v2413_v59, %v4550_v36  ;;  %v3322_v59 = vld [vmem:[%s4635_s5 + $0x94] sm:$0xff]   ;;  %v2589_v9 = vpop.permute.xlu0 %2588 }
 0xbb6   :  { %3507 = vrcp.f32 %v2422_v18  ;;  %v2423_v30 = vadd.f32 2.0, %v2416_v15  ;;  %v2444_v27 = vmul.f32 %v2416_v15, %v4553_v11  ;;  %v2594_v18 = vpop.permute.xlu1 %2593 }
 0xbb7   :  { %v3502_v56 = vpop.eup %3501  ;;  %3509 = vrcp.f32 %v2420_v60  ;;  %v2421_v20 = vadd.f32 2.0, %v2414_v52  ;;  %v2442_v47 = vmul.f32 %v2414_v52, %v4556_v48 }
 0xbb8   :  { %v3504_v54 = vpop.eup %3503  ;;  %3511 = vrcp.f32 %v2423_v30  ;;  %v2412_v55 = vadd.f32 2.0, %v3502_v56 }
 0xbb9   :  { %3513 = vrcp.f32 %v2421_v20  ;;  %v2410_v8 = vadd.f32 2.0, %v3504_v54  ;;  %v2599_v15 = vpop.permute.xlu0 %2598 }
 0xbba   :  { %v3506_v57 = vpop.eup %3505  ;;  %v2419_v28 = vmul.f32 %v3502_v56, %v2412_v55 }
 0xbbb   :  { %v2417_v29 = vmul.f32 %v3504_v54, %v2410_v8  ;;  %v2411_v32 = vadd.f32 2.0, %v3506_v57  ;;  %v2604_v8 = vpop.permute.xlu1 %2603 }
 0xbbc   :  { %v2426_v33 = vadd.f32 2.0, %v2419_v28  ;;  %v2447_v35 = vmul.f32 %v2419_v28, %v4560_v13 }
 0xbbd   :  { %v2424_v63 = vadd.f32 2.0, %v2417_v29  ;;  %v2418_v38 = vmul.f32 %v3506_v57, %v2411_v32  ;;  %v2445_v41 = vmul.f32 %v2417_v29, %v4562_v39  ;;  %v2609_v32 = vpop.permute.xlu0 %2608 }
 0xbbe   :  { %3515 = vrcp.f32 %v2426_v33 }
 0xbbf   :  { %3517 = vrcp.f32 %v2424_v63  ;;  %v2425_v42 = vadd.f32 2.0, %v2418_v38  ;;  %v2446_v16 = vmul.f32 %v2418_v38, %v4566_v25 }
 0xbc0   :  { %v3508_v37 = vpop.eup %3507 }
 0xbc1   :  { %v3510_v22 = vpop.eup %3509  ;;  %3519 = vrcp.f32 %v2425_v42  ;;  %v2450_v45 = vmul.f32 %v3508_v37, %v2443_v0 }
 0xbc2   :  { %v3512_v17 = vpop.eup %3511  ;;  %v2448_v46 = vmul.f32 %v3510_v22, %v2441_v43  ;;  %v2619_v22 = vpop.permute.xlu0 %2618 }
 0xbc3   :  { %v3514_v21 = vpop.eup %3513  ;;  %v2451_v23 = vmul.f32 %v3512_v17, %v2444_v27  ;;  %v2457_v51 = vsel %vm2436_vm1, %v4548_v58, %v2450_v45  ;;  %v2614_v27 = vpop.permute.xlu1 %2613 }
 0xbc4   :  { %v2449_v34 = vmul.f32 %v3514_v21, %v2442_v47  ;;  %v2455_v44 = vsel %vm2434_vm3, %v4550_v36, %v2448_v46 }
 0xbc5   :  { %v2458_v49 = vsel %vm2437_vm2, %v4553_v11, %v2451_v23 }
 0xbc6   :  { %v2456_v26 = vsel %vm2435_vm4, %v4556_v48, %v2449_v34  ;;  %v2471_v62 = vpack.c.bf16 %v2458_v49, %v2457_v51 }
 0xbc7   :  { %v2470_v53 = vpack.c.bf16 %v2456_v26, %v2455_v44 }
 0xbc8   :  { %v3516_v5 = vpop.eup %3515 }
 0xbc9   :  { %v3518_v31 = vpop.eup %3517  ;;  %3222 = vmatprep.subr.bf16.mxu1 %v2470_v53  ;;  %v2454_v7 = vmul.f32 %v3516_v5, %v2447_v35 }
 0xbca   :  { %3223 = vmatpush3.bf16.msra.mxu1 %v2470_v53  ;;  %v2452_v58 = vmul.f32 %v3518_v31, %v2445_v41 }
 0xbcb   :  { %v3520_v3 = vpop.eup %3519  ;;  %3224 = vmatprep.subr.bf16.mxu1 %v2471_v62  ;;  %v2461_v4 = vsel %vm2440_vm5, %v4560_v13, %v2454_v7  ;;  %v3324_v13 = vld [vmem:[%s4635_s5 + $0xa4] ss:$0 sps:$4 sm:$0x11]  }
 0xbcc   :  { %v2453_v11 = vmul.f32 %v3520_v3, %v2446_v16  ;;  %v2459_v36 = vsel %vm2438_vm6, %v4562_v39, %v2452_v58  ;;  %v2473_v10 = vpack.c.bf16 %v2461_v4, %v2461_v4  ;;  %v3323_v39 = vld [vmem:[%s4635_s5 + $0x9c] sm:$0xff]  }
 0xbce   :  { %3225 = vmatpush3.bf16.msra.mxu1 %v2471_v62  ;;  %v2460_v48 = vsel %vm2439_vm7, %v4566_v25, %v2453_v11  ;;  %v2505_v40 = vsel %vm344_vm8, %v2473_v10, 0  ;;  %v3549_v25 = vmov 0.0  }
 0xbcf   :  { %v2472_v12 = vpack.c.bf16 %v2460_v48, %v2459_v36  ;;  %3238 = vmatprep.subr.bf16.mxu0 %v3549_v25  ;;  %3246 = vmatprep.mubr.msk.bf16.mxu0 %vm3550_vm9, %v3549_v25 }
 0xbd1   :  { %3226 = vmatprep.subr.bf16.mxu1 %v2472_v12 }
 0xbd2   :  { %3227 = vmatpush3.bf16.msra.mxu1 %v2472_v12 }
 0xbd3   :  { %3261 = vmatprep.subr.msk.bf16.mxu1 %vm344_vm8, %v2473_v10 }
 0xbd6   :  { %3229 = vmatpush3.bf16.msra.mxu1 %v2505_v40 }
 0xbd9   :  { %3231 = vmatmul.mubr.msk.bf16.vlgmr.msra.gmra.mrb[40].mxu1 %vm331_vm0, %v3322_v59 }
 0xbda   :  { %3234 = vmatprep.mubr.msk.bf16.mxu1 %vm331_vm0, %v3323_v39 }
 0xbe1   :  { %3235 = vmatmul.mubr.msk.bf16.gmra.mrb[44].mxu1 %vm331_vm0, %v3324_v13 }
 0xcac   :  { %v3232_v60 = vpop.f32.mrb[40].mxu1 }
 0xcad   :  { %v2573_v52 = vadd.f32 %v3232_v60, %v4511_v14  ;;  %v2541_v30 = vpop.f32.mrb[41].mxu1 }
 0xcae   :  { %v2571_v56 = vadd.f32 %v2541_v30, %v4505_v61  ;;  %v3233_v20 = vpop.f32.mrb[42].mxu1 }
 0xcaf   :  { %v2574_v54 = vadd.f32 %v3233_v20, %v4507_v2  ;;  %v2544_v55 = vpop.f32.mrb[43].mxu1  ;;  %v2623_v28 = vadd.f32 %v2599_v15, %v2573_v52 }
 0xcb0   :  { %v2572_v57 = vadd.f32 %v2544_v55, %v4509_v6  ;;  %v2621_v33 = vadd.f32 %v2589_v9, %v2571_v56 }
 0xcb1   :  { %v2624_v29 = vadd.f32 %v2604_v8, %v2574_v54 }
 0xcb2   :  { %v2622_v63 = vadd.f32 %v2594_v18, %v2572_v57 }
 0xcb3   :  { %v2630_v38 = vpack.c.bf16 %v2624_v29, %v2623_v28 }
 0xcb4   :  { %v2629_v0 = vpack.c.bf16 %v2622_v63, %v2621_v33  ;;  %v3236_v42 = vpop.f32.mrb[44].mxu1 }
 0xcb5   :  { %v2577_v14 = vadd.f32 %v3236_v42, %v4520_v19  ;;  %v2557_v37 = vpop.f32.mrb[45].mxu1 }
 0xcb6   :  { %v2575_v61 = vadd.f32 %v2557_v37, %v4522_v50  ;;  %v3237_v43 = vpop.f32.mrb[46].mxu1  ;;  %3239 = vmatpush3.bf16.msra.mxu0 %v2629_v0  ;;  %v2628_v50 = vld [vmem:[%s4637_s7] sm:$0xf]  ;;  %s3523_s7 = scalar_lea.vmem %s2701_s13, 128 }
 0xcb7   :  { %v2560_v2 = vpop.f32.mrb[47].mxu1  ;;  %3240 = vmatprep.subr.bf16.mxu0 %v3549_v25  ;;  %v2627_v45 = vadd.f32 %v2619_v22, %v2577_v14  ;;  %p3524_p0 = scmp.ne.s32.totalorder %s2701_s13, %s3523_s7  ;;  %p3529_p2 = scmp.lt.s32.totalorder %s3523_s7, %s3523_s7 }
 0xcb8   :  { %v2576_v6 = vadd.f32 %v2560_v2, %v4524_v24  ;;  %v2625_v17 = vadd.f32 %v2609_v32, %v2575_v61  ;;  %v2637_v24 = vpop.permute.xlu1 %2636 }
 0xcb9   :  { %v2632_v21 = vpack.c.bf16 %v2627_v45, %v2627_v45  ;;  %p3530_p3 = por %p3529_p2, %p3528_p1 }
 0xcba   :  { %v2626_v47 = vadd.f32 %v2614_v27, %v2576_v6  ;;  %3241 = vmatpush3.bf16.msra.mxu0 %v2630_v38 }
 0xcbb   :  { %3242 = vmatprep.subr.bf16.mxu0 %v3549_v25  ;;  %v2643_v19 = vsel %vm344_vm8, %v2632_v21, 0  ;;  %vm2689_vm8 = vmor %vm2687_vm10, %vm2688_vm11  ;;  %p3531_p4 = pnand %p3530_p3, %p3524_p0 }
 0xcbc   :  { %v2631_v46 = vpack.c.bf16 %v2626_v47, %v2625_v17 }
 0xcbe   :  { %3243 = vmatpush3.bf16.msra.mxu0 %v2631_v46 }
 0xcbf   :  { %3244 = vmatprep.subr.bf16.mxu0 %v3549_v25 }
 0xcc2   :  { %3245 = vmatpush3.bf16.msra.mxu0 %v2643_v19 }
 0xcc5   :  { %3247 = vmatmul.mubr.msk.bf16.vlgmr.msra.gmra.mrb[48].mxu0 %vm331_vm0, %v2628_v50 }
 0xd98   :  { %v2679_v23 = vpop.f32.mrb[48].mxu0 }
 0xd99   :  { %v2680_v34 = vadd.f32 %v2679_v23, %v2637_v24  ;;  %v3248_v51 = vpop.f32.mrb[49].mxu0 }
 0xd9a   :  { %v2682_v49 = vpop.f32.mrb[50].mxu0 }
 0xd9b   :  { %v2690_v44 = vmul.f32 1.442695, %v2680_v34  ;;  %v3249_v26 = vpop.f32.mrb[51].mxu0 }
 0xd9d   :  { %3521 = vpow2.f32 %v2690_v44 }
 0xda7   :  { %v3522_v62 = vpop.eup %3521 }
 0xda8   :  { %v2692_v53 = vsel %vm2689_vm8, %v3522_v62, %v2680_v34 }
 0xda9   :  { %2693 = vst [vmem:[#allocation2] sm:$0xff] %v2692_v53 }
 0xdaa   :  { %3534 = shalt.err (!%p3531_p4)
}
 0xdab   :  { %s3535_s16 = scalar_lea.hbm %s4639_s9, 128 }
 0xdac   :  { %p3536_p5 = scmp.ne.s32.totalorder %s4639_s9, %s3535_s16  ;;  %p3539_p6 = scmp.lt.u32.totalorder %s3535_s16, %s4639_s9 }
 0xdae   :  { %p3541_p7 = pnand %p3539_p6, %p3536_p5 }
 0xdb0   :  { %3544 = shalt.err (!%p3541_p7)
}
 0xdb1   :  { %2703 = dma.vmem_to_hbm [thread:$0]  %s2701_s13, 128, %s4639_s9, [#allocation3]  }
 0xdb2   :  { %3545 = dma.done.wait [#allocation3], 128  }
 0xdb3   :  { %3546 = vsyncadd [#allocation3], 4294967168 }
 0xdb4   :  { %2707 = vsyncpa [#allocation3], 1 }

</bundles_post_ra>
